<compile_context>
chip_gen: v5e
topology: v5e:2x2
jax: 0.10.0
libtpu: 0.0.40
codegen_flags: <defaults>
</compile_context>

<pallas_src>
import functools

import jax
import jax.numpy as jnp
from jax.experimental import pallas as pl
from jax.experimental.pallas import tpu as pltpu


# -----------------------------------------------------------------------------
# Kernel 1: fused SpatialGroupEnhance (both inputs) + Router pooling stats.
# -----------------------------------------------------------------------------
def _sge_stats_kernel(x1_ref, x2_ref, mg_ref, mgt_ref, gw_ref, gb_ref,
                      y1_ref, y2_ref, st_ref, *, hw_valid):
    nb, e, hwp = x1_ref.shape
    padded = hw_valid != hwp
    inv_hw = 1.0 / hw_valid
    inv_hw1 = 1.0 / max(hw_valid - 1, 1)           # torch .std() is unbiased (ddof=1)

    x1 = x1_ref[...].astype(jnp.float32)           # upcast in-kernel (bf16 inputs OK)
    x2 = x2_ref[...].astype(jnp.float32)

    if padded:                                     # lane-padding guard (H*W % 128 != 0)
        lane = jax.lax.broadcasted_iota(jnp.int32, (1, 1, hwp), 2)
        valid3 = lane < hw_valid
        neg = jnp.finfo(jnp.float32).min
        x1 = jnp.where(valid3, x1, 0.0)
        x2 = jnp.where(valid3, x2, 0.0)
        x1_mx = jnp.where(valid3, x1, neg)
        x2_mx = jnp.where(valid3, x2, neg)
    else:
        x1_mx, x2_mx = x1, x2

    # --- Router pooling, fused so x1/x2 are read from HBM only once ------------------
    # cat([x1, x2], C) is never built: f = [max(x1), max(x2), avg(x1), avg(x2)].
    mx1 = jnp.max(x1_mx, axis=-1)                  # [nb, e]
    mx2 = jnp.max(x2_mx, axis=-1)
    av1 = jnp.sum(x1, axis=-1) * inv_hw
    av2 = jnp.sum(x2, axis=-1) * inv_hw
    stats = jnp.concatenate([mx1, mx2, av1, av2], axis=-1)    # [nb, 4e]
    st_ref[:, 0, :] = stats

    # --- SpatialGroupEnhance gate (module applies spatial_att_1 to BOTH inputs) ------
    mg = mg_ref[...]                               # [g, e]  0/1 group indicator
    mgt = mgt_ref[...]                             # [e, g]
    gw = gw_ref[...]                               # [g, 1]
    gb = gb_ref[...]                               # [g, 1]

    def sge_one(xs):                               # xs: [e, hwp] f32 (zero-padded lanes)
        av = jnp.sum(xs, axis=-1, keepdims=True) * inv_hw             # [e, 1]
        xn = jnp.dot(mg, xs * av, preferred_element_type=jnp.float32)  # [g, hwp] MXU
        mu = jnp.sum(xn, axis=-1, keepdims=True) * inv_hw
        t = xn - mu
        tv = jnp.where(valid3[0], t, 0.0) if padded else t
        var = jnp.sum(tv * tv, axis=-1, keepdims=True) * inv_hw1
        inv_std = 1.0 / (jnp.sqrt(var) + 1e-5)     # exact divide on [g,1] (torch parity)
        t = (t * inv_std) * gw + gb
        gate = jnp.dot(mgt, jax.nn.sigmoid(t),
                       preferred_element_type=jnp.float32)             # [e, hwp] MXU
        return xs * gate

    # Static unroll over the Nb samples in this block; each iteration is two tiny
    # 2-D indicator matmuls (MXU has total slack) and lane-axis reductions.
    for i in range(nb):
        y1_ref[i] = sge_one(x1[i]).astype(y1_ref.dtype)
        y2_ref[i] = sge_one(x2[i]).astype(y2_ref.dtype)


def _pick_block_samples(batch, per_sample_bytes):
    # Target ~1 MiB per activation tile per grid step (>=85% of HBM roofline per the
    # measured tile-size data).  With 2 inputs + 2 outputs double-buffered this stays
    # well under the 16 MiB v5e scoped-VMEM default and far under v7x's 64 MiB VMEM,
    # so no vmem_limit_bytes override is required on any generation.  The cap of 16
    # also bounds the static in-kernel unroll.
    cap = max(1, min(16, (1 << 20) // max(per_sample_bytes, 1)))
    nb = 1
    for d in range(1, batch + 1):
        if batch % d == 0 and d <= cap:
            nb = d
    return nb


def _sge_router_stats(sge_p, x1f, x2f, hw_valid):
    """x1f, x2f: [B, E, HWp] (HWp a multiple of 128).  Returns (y1, y2, stats[B,4E])."""
    B, E, HWp = x1f.shape
    G = sge_p["mg"].shape[0]
    nb = _pick_block_samples(B, E * HWp * x1f.dtype.itemsize)

    xspec = pl.BlockSpec((nb, E, HWp), lambda n: (n, 0, 0))

    def pspec(shape):
        return pl.BlockSpec(shape, lambda n: (0,) * len(shape))

    kernel = functools.partial(_sge_stats_kernel, hw_valid=hw_valid)
    y1, y2, stats = pl.pallas_call(
        kernel,
        out_shape=(jax.ShapeDtypeStruct((B, E, HWp), x1f.dtype),
                   jax.ShapeDtypeStruct((B, E, HWp), x2f.dtype),
                   jax.ShapeDtypeStruct((B, 1, 4 * E), jnp.float32)),
        grid=(B // nb,),
        in_specs=[xspec, xspec,
                  pspec((G, E)), pspec((E, G)), pspec((G, 1)), pspec((G, 1))],
        out_specs=[xspec, xspec,
                   pl.BlockSpec((nb, 1, 4 * E), lambda n: (n, 0, 0))],
        compiler_params=pltpu.CompilerParams(
            dimension_semantics=("parallel",)),       # shards samples across v7x's 2 TCs
    )(x1f, x2f, sge_p["mg"], sge_p["mgt"], sge_p["gw"], sge_p["gb"])
    return y1, y2, stats.reshape(B, 4 * E)


# -----------------------------------------------------------------------------
# Kernel 2: Router MLP on the tiny pooled stats (the heavy reads already happened
# in the gridded kernel above, so a grid-less call here is fine on every chip).
# -----------------------------------------------------------------------------
def _router_mlp_kernel(f_ref, w1_ref, b1_ref, w2_ref, b2_ref, pp_ref):
    f = f_ref[...]
    h = jnp.dot(f, w1_ref[...], preferred_element_type=jnp.float32) + b1_ref[...]
    h = jnp.maximum(h, 0.0)                                       # ReLU
    o = jnp.dot(h, w2_ref[...], preferred_element_type=jnp.float32) + b2_ref[...]
    pp_ref[...] = jnp.maximum(jnp.tanh(o), 0.0)                   # activateFunc


def _router_mlp(router_p, stats):
    B = stats.shape[0]
    P = router_p["w2"].shape[1]
    return pl.pallas_call(
        _router_mlp_kernel,
        out_shape=jax.ShapeDtypeStruct((B, P), jnp.float32),
    )(stats, router_p["w1"], router_p["b1"], router_p["w2"], router_p["b2"])


# -----------------------------------------------------------------------------
# SpatailCell forward
# -----------------------------------------------------------------------------
@jax.jit
def spatail_cell_forward(params, x1, x2):
    """x1, x2: [B, E, H, W] (NCHW, matching the PyTorch module)."""
    B, E, H, W = x1.shape
    HW = H * W
    HWp = ((HW + 127) // 128) * 128
    x1f = x1.reshape(B, E, HW)                    # free reshape, H*W on lanes
    x2f = x2.reshape(B, E, HW)
    if HWp != HW:
        # Lane-dense guard: pad spatial axis to a multiple of 128 so stores stay
        # full-width; reductions are masked in-kernel.
        # TODO(synk): for production, fold channels into lanes upstream instead of
        # paying this one extra padding copy.
        x1f = jnp.pad(x1f, ((0, 0), (0, 0), (0, HWp - HW)))
        x2f = jnp.pad(x2f, ((0, 0), (0, 0), (0, HWp - HW)))

    # Single fused HBM pass: SGE outputs for both inputs + router pooling stats.
    y1, y2, stats = _sge_router_stats(params["sge1"], x1f, x2f, HW)
    path_prob = _router_mlp(params["router"], stats)

    if HWp != HW:
        y1 = y1[..., :HW]
        y2 = y2[..., :HW]
    emb1 = y1.reshape(B, E, H, W)
    emb2 = y2.reshape(B, E, H, W)
    return (emb1, emb2), path_prob


# -----------------------------------------------------------------------------
# Deterministic parameter construction (shapes from the module __init__).
# NOTE: weights are stored (in, out) for x @ W; when porting real PyTorch weights,
# transpose nn.Linear.weight and keep the [max, avg] pooled-feature ordering.
# -----------------------------------------------------------------------------
def init_params(key, embed_size, num_out_path, groups=8):
    E = embed_size
    assert E % groups == 0, "embed_size must be divisible by groups (as in PyTorch)"
    k = jax.random.split(key, 6)

    # Router(num_out_path, embed_size*2): mlp = Linear(4E, 2E) -> ReLU -> Linear(2E, P)
    router = {
        "w1": jax.random.normal(k[0], (4 * E, 2 * E), jnp.float32) * 0.05,
        "b1": jnp.zeros((1, 2 * E), jnp.float32),
        "w2": jax.random.normal(k[1], (2 * E, num_out_path), jnp.float32) * 0.05,
        "b2": jnp.full((1, num_out_path), 1.5, jnp.float32),   # mlp[2].bias = 1.5
    }

    # SpatialGroupEnhance(groups): per-group scale/shift (module default is zeros;
    # small random values here so the demo exercises the full normalization path).
    gid = jnp.arange(E) // (E // groups)
    mg = (gid[None, :] == jnp.arange(groups)[:, None]).astype(jnp.float32)   # [G, E]
    def sge(ka, kb):
        return {"gw": jax.random.normal(ka, (groups, 1), jnp.float32) * 0.1,
                "gb": jax.random.normal(kb, (groups, 1), jnp.float32) * 0.1,
                "mg": mg, "mgt": jnp.transpose(mg)}
    sge1 = sge(k[2], k[3])
    sge2 = sge(k[4], k[5])   # present in the module but unused by forward
    return {"router": router, "sge1": sge1, "sge2": sge2}


# -----------------------------------------------------------------------------
# Pure-JAX reference (mirrors the PyTorch module op-for-op) for validation.
# -----------------------------------------------------------------------------
def _reference_forward(params, x1, x2):
    B, E, H, W = x1.shape
    G = params["sge1"]["gw"].shape[0]

    def router(x12):
        mx = jnp.max(x12, axis=(2, 3))
        avg = jnp.mean(x12, axis=(2, 3))
        f = jnp.concatenate([mx, avg], axis=1)
        p = params["router"]
        h = jax.nn.relu(f @ p["w1"] + p["b1"])
        o = h @ p["w2"] + p["b2"]
        return jax.nn.relu(jnp.tanh(o))

    def sge(x, gw, gb):
        b, c, h, w = x.shape
        xg = x.reshape(b * G, c // G, h, w)
        avg = jnp.mean(xg, axis=(2, 3), keepdims=True)
        xn = (xg * avg).sum(axis=1, keepdims=True)
        t = xn.reshape(b * G, -1)
        t = t - t.mean(axis=1, keepdims=True)
        std = jnp.std(t, axis=1, ddof=1, keepdims=True) + 1e-5
        t = t / std
        t = t.reshape(b, G, h, w) * gw.reshape(1, G, 1, 1) + gb.reshape(1, G, 1, 1)
        t = t.reshape(b * G, 1, h, w)
        return (xg * jax.nn.sigmoid(t)).reshape(b, c, h, w)

    pp = router(jnp.concatenate([x1, x2], axis=1))
    s = params["sge1"]                       # module quirk: spatial_att_1 for both
    return sge(x1, s["gw"], s["gb"]), sge(x2, s["gw"], s["gb"]), pp


# -----------------------------------------------------------------------------
if __name__ == "__main__":
    def run_case(B, E, H, W, num_out_path):
        key = jax.random.PRNGKey(0)
        kp, k1, k2 = jax.random.split(key, 3)
        params = init_params(kp, E, num_out_path)
        x1 = jax.random.normal(k1, (B, E, H, W), jnp.float32)   # NCHW, like the module
        x2 = jax.random.normal(k2, (B, E, H, W), jnp.float32)

        (emb1, emb2), pp = jax.block_until_ready(spatail_cell_forward(params, x1, x2))

        assert emb1.shape == (B, E, H, W), emb1.shape
        assert emb2.shape == (B, E, H, W), emb2.shape
        assert pp.shape == (B, num_out_path), pp.shape
        assert bool(jnp.all(jnp.isfinite(emb1)))
        assert bool(jnp.all(jnp.isfinite(emb2)))
        assert bool(jnp.all(jnp.isfinite(pp)))
        assert bool(jnp.all(pp >= 0.0))          # relu(tanh(.)) is non-negative

        r1, r2, rpp = _reference_forward(params, x1, x2)
        # Tolerance covers TPU MXU f32 pass behavior + EUP tanh/sigmoid vs XLA; the
        # 1/std path uses an exact divide so normalization numerics match torch.
        tol = dict(rtol=5e-3, atol=5e-3)
        assert bool(jnp.allclose(emb1, r1, **tol))
        assert bool(jnp.allclose(emb2, r2, **tol))
        assert bool(jnp.allclose(pp, rpp, **tol))

    run_case(2, 16, 16, 16, 4)   # H*W = 256: lane-aligned fast path (no masking)
    run_case(2, 16, 12, 12, 4)   # H*W = 144: padded to 256, masked-reduction path
    print("KERNEL_OK")
</pallas_src>

<mosaic_0001>
module attributes {stable_mosaic.version = 11 : i64} {
  func.func @_router_mlp_kernel(%arg0: memref<2x64xf32, #tpu.memory_space<vmem>>, %arg1: memref<64x32xf32, #tpu.memory_space<vmem>>, %arg2: memref<1x32xf32, #tpu.memory_space<vmem>>, %arg3: memref<32x4xf32, #tpu.memory_space<vmem>>, %arg4: memref<1x4xf32, #tpu.memory_space<vmem>>, %arg5: memref<2x4xf32, #tpu.memory_space<vmem>>) attributes {dimension_semantics = [], scalar_prefetch = 0 : i64, scratch_operands = 0 : i64, tpu.core_type = #tpu.core_type<tc>} {
    %c0 = arith.constant 0 : index
    %c0_0 = arith.constant 0 : index
    %0 = vector.load %arg0[%c0, %c0_0] : memref<2x64xf32, #tpu.memory_space<vmem>>, vector<2x64xf32>
    %c0_1 = arith.constant 0 : index
    %c0_2 = arith.constant 0 : index
    %1 = vector.load %arg1[%c0_1, %c0_2] : memref<64x32xf32, #tpu.memory_space<vmem>>, vector<64x32xf32>
    %cst = arith.constant dense<0.000000e+00> : vector<2x32xf32>
    %2 = tpu.matmul %0, %1, %cst {dimension_numbers = #tpu.dot_dimension_numbers<[1], [0], [0], [1], [0, 0, 1, 1], [], []>} : vector<2x64xf32>, vector<64x32xf32>, vector<2x32xf32> -> vector<2x32xf32>
    %c0_3 = arith.constant 0 : index
    %c0_4 = arith.constant 0 : index
    %3 = vector.load %arg2[%c0_3, %c0_4] : memref<1x32xf32, #tpu.memory_space<vmem>>, vector<1x32xf32>
    %4 = vector.broadcast %3 : vector<1x32xf32> to vector<2x32xf32>
    %5 = arith.addf %2, %4 : vector<2x32xf32>
    %cst_5 = arith.constant 0.000000e+00 : f32
    %6 = vector.broadcast %cst_5 : f32 to vector<2x32xf32>
    %7 = arith.maximumf %5, %6 : vector<2x32xf32>
    %c0_6 = arith.constant 0 : index
    %c0_7 = arith.constant 0 : index
    %8 = vector.load %arg3[%c0_6, %c0_7] : memref<32x4xf32, #tpu.memory_space<vmem>>, vector<32x4xf32>
    %cst_8 = arith.constant dense<0.000000e+00> : vector<2x4xf32>
    %9 = tpu.matmul %7, %8, %cst_8 {dimension_numbers = #tpu.dot_dimension_numbers<[1], [0], [0], [1], [0, 0, 1, 1], [], []>} : vector<2x32xf32>, vector<32x4xf32>, vector<2x4xf32> -> vector<2x4xf32>
    %c0_9 = arith.constant 0 : index
    %c0_10 = arith.constant 0 : index
    %10 = vector.load %arg4[%c0_9, %c0_10] : memref<1x4xf32, #tpu.memory_space<vmem>>, vector<1x4xf32>
    %11 = vector.broadcast %10 : vector<1x4xf32> to vector<2x4xf32>
    %12 = arith.addf %9, %11 : vector<2x4xf32>
    %13 = math.tanh %12 : vector<2x4xf32>
    %cst_11 = arith.constant 0.000000e+00 : f32
    %14 = vector.broadcast %cst_11 : f32 to vector<2x4xf32>
    %15 = arith.maximumf %13, %14 : vector<2x4xf32>
    %c0_12 = arith.constant 0 : index
    %c0_13 = arith.constant 0 : index
    %16 = vector.load %arg5[%c0_12, %c0_13] : memref<2x4xf32, #tpu.memory_space<vmem>>, vector<2x4xf32>
    tpu.vector_store %arg5[%c0_12, %c0_13], %15 {strides = array<i32>} : memref<2x4xf32, #tpu.memory_space<vmem>>, vector<2x4xf32>,
    return
  }
}

module attributes {stable_mosaic.version = 11 : i64} {
  func.func @_sge_stats_kernel(%arg0: i32, %arg1: memref<2x16x256xf32, #tpu.memory_space<vmem>>, %arg2: memref<2x16x256xf32, #tpu.memory_space<vmem>>, %arg3: memref<8x16xf32, #tpu.memory_space<vmem>>, %arg4: memref<16x8xf32, #tpu.memory_space<vmem>>, %arg5: memref<8x1xf32, #tpu.memory_space<vmem>>, %arg6: memref<8x1xf32, #tpu.memory_space<vmem>>, %arg7: memref<2x16x256xf32, #tpu.memory_space<vmem>>, %arg8: memref<2x16x256xf32, #tpu.memory_space<vmem>>, %arg9: memref<2x1x64xf32, #tpu.memory_space<vmem>>) attributes {dimension_semantics = [#tpu.dimension_semantics<parallel>], iteration_bounds = array<i64: 1>, scalar_prefetch = 0 : i64, scratch_operands = 0 : i64, tpu.core_type = #tpu.core_type<tc>, window_params = [{transform_indices = @transform_0, window_bounds = array<i64: 2, 16, 256>}, {transform_indices = @transform_1, window_bounds = array<i64: 2, 16, 256>}, {pipeline_mode = #tpu.pipeline_mode<synchronous>, transform_indices = @transform_2, window_bounds = array<i64: 8, 16>}, {pipeline_mode = #tpu.pipeline_mode<synchronous>, transform_indices = @transform_3, window_bounds = array<i64: 16, 8>}, {pipeline_mode = #tpu.pipeline_mode<synchronous>, transform_indices = @transform_4, window_bounds = array<i64: 8, 1>}, {pipeline_mode = #tpu.pipeline_mode<synchronous>, transform_indices = @transform_5, window_bounds = array<i64: 8, 1>}, {transform_indices = @transform_6, window_bounds = array<i64: 2, 16, 256>}, {transform_indices = @transform_7, window_bounds = array<i64: 2, 16, 256>}, {transform_indices = @transform_8, window_bounds = array<i64: 2, 1, 64>}]} {
    %c0 = arith.constant 0 : index
    %c0_0 = arith.constant 0 : index
    %c0_1 = arith.constant 0 : index
    %0 = vector.load %arg1[%c0, %c0_0, %c0_1] : memref<2x16x256xf32, #tpu.memory_space<vmem>>, vector<2x16x256xf32>
    %c0_2 = arith.constant 0 : index
    %c0_3 = arith.constant 0 : index
    %c0_4 = arith.constant 0 : index
    %1 = vector.load %arg2[%c0_2, %c0_3, %c0_4] : memref<2x16x256xf32, #tpu.memory_space<vmem>>, vector<2x16x256xf32>
    %cst = arith.constant dense<0xFF800000> : vector<2x16xf32>
    %2 = vector.multi_reduction <maximumf>, %0, %cst [2] : vector<2x16x256xf32> to vector<2x16xf32>
    %cst_5 = arith.constant dense<0xFF800000> : vector<2x16xf32>
    %3 = vector.multi_reduction <maximumf>, %1, %cst_5 [2] : vector<2x16x256xf32> to vector<2x16xf32>
    %cst_6 = arith.constant dense<0.000000e+00> : vector<2x16xf32>
    %4 = vector.multi_reduction <add>, %0, %cst_6 [2] : vector<2x16x256xf32> to vector<2x16xf32>
    %cst_7 = arith.constant 3.906250e-03 : f32
    %5 = vector.broadcast %cst_7 : f32 to vector<2x16xf32>
    %6 = arith.mulf %4, %5 : vector<2x16xf32>
    %cst_8 = arith.constant dense<0.000000e+00> : vector<2x16xf32>
    %7 = vector.multi_reduction <add>, %1, %cst_8 [2] : vector<2x16x256xf32> to vector<2x16xf32>
    %cst_9 = arith.constant 3.906250e-03 : f32
    %8 = vector.broadcast %cst_9 : f32 to vector<2x16xf32>
    %9 = arith.mulf %7, %8 : vector<2x16xf32>
    %10 = tpu.concatenate %2, %3, %6, %9 in 1 : vector<2x16xf32>, vector<2x16xf32>, vector<2x16xf32>, vector<2x16xf32> -> vector<2x64xf32>
    %c0_10 = arith.constant 0 : index
    %c0_11 = arith.constant 0 : index
    %c0_12 = arith.constant 0 : index
    %11 = vector.load %arg9[%c0_10, %c0_11, %c0_12] : memref<2x1x64xf32, #tpu.memory_space<vmem>>, vector<2x1x64xf32>
    %12 = vector.shape_cast %11 : vector<2x1x64xf32> to vector<2x64xf32>
    %13 = vector.shape_cast %10 : vector<2x64xf32> to vector<2x1x64xf32>
    tpu.vector_store %arg9[%c0_10, %c0_11, %c0_12], %13 {strides = array<i32>} : memref<2x1x64xf32, #tpu.memory_space<vmem>>, vector<2x1x64xf32>,
    %c0_13 = arith.constant 0 : index
    %c0_14 = arith.constant 0 : index
    %14 = vector.load %arg3[%c0_13, %c0_14] : memref<8x16xf32, #tpu.memory_space<vmem>>, vector<8x16xf32>
    %c0_15 = arith.constant 0 : index
    %c0_16 = arith.constant 0 : index
    %15 = vector.load %arg4[%c0_15, %c0_16] : memref<16x8xf32, #tpu.memory_space<vmem>>, vector<16x8xf32>
    %c0_17 = arith.constant 0 : index
    %c0_18 = arith.constant 0 : index
    %16 = vector.load %arg5[%c0_17, %c0_18] : memref<8x1xf32, #tpu.memory_space<vmem>>, vector<8x1xf32>
    %c0_19 = arith.constant 0 : index
    %c0_20 = arith.constant 0 : index
    %17 = vector.load %arg6[%c0_19, %c0_20] : memref<8x1xf32, #tpu.memory_space<vmem>>, vector<8x1xf32>
    %18 = vector.extract_strided_slice %0 {offsets = [0, 0, 0], sizes = [1, 16, 256], strides = [1, 1, 1]} : vector<2x16x256xf32> to vector<1x16x256xf32>
    %19 = vector.shape_cast %18 : vector<1x16x256xf32> to vector<16x256xf32>
    %cst_21 = arith.constant dense<0.000000e+00> : vector<16xf32>
    %20 = vector.multi_reduction <add>, %19, %cst_21 [1] : vector<16x256xf32> to vector<16xf32>
    %21 = vector.shape_cast %20 : vector<16xf32> to vector<16x1xf32>
    %cst_22 = arith.constant 3.906250e-03 : f32
    %22 = vector.broadcast %cst_22 : f32 to vector<16x1xf32>
    %23 = arith.mulf %21, %22 : vector<16x1xf32>
    %24 = vector.broadcast %23 : vector<16x1xf32> to vector<16x256xf32>
    %25 = arith.mulf %19, %24 : vector<16x256xf32>
    %cst_23 = arith.constant dense<0.000000e+00> : vector<8x256xf32>
    %26 = tpu.matmul %14, %25, %cst_23 {dimension_numbers = #tpu.dot_dimension_numbers<[1], [0], [0], [1], [0, 0, 1, 1], [], []>} : vector<8x16xf32>, vector<16x256xf32>, vector<8x256xf32> -> vector<8x256xf32>
    %cst_24 = arith.constant dense<0.000000e+00> : vector<8xf32>
    %27 = vector.multi_reduction <add>, %26, %cst_24 [1] : vector<8x256xf32> to vector<8xf32>
    %28 = vector.shape_cast %27 : vector<8xf32> to vector<8x1xf32>
    %cst_25 = arith.constant 3.906250e-03 : f32
    %29 = vector.broadcast %cst_25 : f32 to vector<8x1xf32>
    %30 = arith.mulf %28, %29 : vector<8x1xf32>
    %31 = vector.broadcast %30 : vector<8x1xf32> to vector<8x256xf32>
    %32 = arith.subf %26, %31 : vector<8x256xf32>
    %33 = arith.mulf %32, %32 : vector<8x256xf32>
    %cst_26 = arith.constant dense<0.000000e+00> : vector<8xf32>
    %34 = vector.multi_reduction <add>, %33, %cst_26 [1] : vector<8x256xf32> to vector<8xf32>
    %35 = vector.shape_cast %34 : vector<8xf32> to vector<8x1xf32>
    %cst_27 = arith.constant 0.00392156886 : f32
    %36 = vector.broadcast %cst_27 : f32 to vector<8x1xf32>
    %37 = arith.mulf %35, %36 : vector<8x1xf32>
    %38 = math.sqrt %37 : vector<8x1xf32>
    %cst_28 = arith.constant 9.99999974E-6 : f32
    %39 = vector.broadcast %cst_28 : f32 to vector<8x1xf32>
    %40 = arith.addf %38, %39 : vector<8x1xf32>
    %cst_29 = arith.constant 1.000000e+00 : f32
    %41 = vector.broadcast %cst_29 : f32 to vector<8x1xf32>
    %42 = arith.divf %41, %40 : vector<8x1xf32>
    %43 = vector.broadcast %42 : vector<8x1xf32> to vector<8x256xf32>
    %44 = arith.mulf %32, %43 : vector<8x256xf32>
    %45 = vector.broadcast %16 : vector<8x1xf32> to vector<8x256xf32>
    %46 = arith.mulf %44, %45 : vector<8x256xf32>
    %47 = vector.broadcast %17 : vector<8x1xf32> to vector<8x256xf32>
    %48 = arith.addf %46, %47 : vector<8x256xf32>
    %49 = arith.negf %48 : vector<8x256xf32>
    %50 = math.exp %49 : vector<8x256xf32>
    %cst_30 = arith.constant 1.000000e+00 : f32
    %51 = vector.broadcast %cst_30 : f32 to vector<8x256xf32>
    %52 = arith.addf %51, %50 : vector<8x256xf32>
    %53 = arith.divf %51, %52 : vector<8x256xf32>
    %cst_31 = arith.constant dense<0.000000e+00> : vector<16x256xf32>
    %54 = tpu.matmul %15, %53, %cst_31 {dimension_numbers = #tpu.dot_dimension_numbers<[1], [0], [0], [1], [0, 0, 1, 1], [], []>} : vector<16x8xf32>, vector<8x256xf32>, vector<16x256xf32> -> vector<16x256xf32>
    %55 = arith.mulf %19, %54 : vector<16x256xf32>
    %c0_32 = arith.constant 0 : index
    %c0_33 = arith.constant 0 : index
    %c0_34 = arith.constant 0 : index
    %56 = vector.load %arg7[%c0_32, %c0_33, %c0_34] : memref<2x16x256xf32, #tpu.memory_space<vmem>>, vector<1x16x256xf32>
    %57 = vector.shape_cast %56 : vector<1x16x256xf32> to vector<16x256xf32>
    %58 = vector.shape_cast %55 : vector<16x256xf32> to vector<1x16x256xf32>
    tpu.vector_store %arg7[%c0_32, %c0_33, %c0_34], %58 {strides = array<i32>} : memref<2x16x256xf32, #tpu.memory_space<vmem>>, vector<1x16x256xf32>,
    %59 = vector.extract_strided_slice %1 {offsets = [0, 0, 0], sizes = [1, 16, 256], strides = [1, 1, 1]} : vector<2x16x256xf32> to vector<1x16x256xf32>
    %60 = vector.shape_cast %59 : vector<1x16x256xf32> to vector<16x256xf32>
    %cst_35 = arith.constant dense<0.000000e+00> : vector<16xf32>
    %61 = vector.multi_reduction <add>, %60, %cst_35 [1] : vector<16x256xf32> to vector<16xf32>
    %62 = vector.shape_cast %61 : vector<16xf32> to vector<16x1xf32>
    %cst_36 = arith.constant 3.906250e-03 : f32
    %63 = vector.broadcast %cst_36 : f32 to vector<16x1xf32>
    %64 = arith.mulf %62, %63 : vector<16x1xf32>
    %65 = vector.broadcast %64 : vector<16x1xf32> to vector<16x256xf32>
    %66 = arith.mulf %60, %65 : vector<16x256xf32>
    %cst_37 = arith.constant dense<0.000000e+00> : vector<8x256xf32>
    %67 = tpu.matmul %14, %66, %cst_37 {dimension_numbers = #tpu.dot_dimension_numbers<[1], [0], [0], [1], [0, 0, 1, 1], [], []>} : vector<8x16xf32>, vector<16x256xf32>, vector<8x256xf32> -> vector<8x256xf32>
    %cst_38 = arith.constant dense<0.000000e+00> : vector<8xf32>
    %68 = vector.multi_reduction <add>, %67, %cst_38 [1] : vector<8x256xf32> to vector<8xf32>
    %69 = vector.shape_cast %68 : vector<8xf32> to vector<8x1xf32>
    %cst_39 = arith.constant 3.906250e-03 : f32
    %70 = vector.broadcast %cst_39 : f32 to vector<8x1xf32>
    %71 = arith.mulf %69, %70 : vector<8x1xf32>
    %72 = vector.broadcast %71 : vector<8x1xf32> to vector<8x256xf32>
    %73 = arith.subf %67, %72 : vector<8x256xf32>
    %74 = arith.mulf %73, %73 : vector<8x256xf32>
    %cst_40 = arith.constant dense<0.000000e+00> : vector<8xf32>
    %75 = vector.multi_reduction <add>, %74, %cst_40 [1] : vector<8x256xf32> to vector<8xf32>
    %76 = vector.shape_cast %75 : vector<8xf32> to vector<8x1xf32>
    %cst_41 = arith.constant 0.00392156886 : f32
    %77 = vector.broadcast %cst_41 : f32 to vector<8x1xf32>
    %78 = arith.mulf %76, %77 : vector<8x1xf32>
    %79 = math.sqrt %78 : vector<8x1xf32>
    %cst_42 = arith.constant 9.99999974E-6 : f32
    %80 = vector.broadcast %cst_42 : f32 to vector<8x1xf32>
    %81 = arith.addf %79, %80 : vector<8x1xf32>
    %cst_43 = arith.constant 1.000000e+00 : f32
    %82 = vector.broadcast %cst_43 : f32 to vector<8x1xf32>
    %83 = arith.divf %82, %81 : vector<8x1xf32>
    %84 = vector.broadcast %83 : vector<8x1xf32> to vector<8x256xf32>
    %85 = arith.mulf %73, %84 : vector<8x256xf32>
    %86 = vector.broadcast %16 : vector<8x1xf32> to vector<8x256xf32>
    %87 = arith.mulf %85, %86 : vector<8x256xf32>
    %88 = vector.broadcast %17 : vector<8x1xf32> to vector<8x256xf32>
    %89 = arith.addf %87, %88 : vector<8x256xf32>
    %90 = arith.negf %89 : vector<8x256xf32>
    %91 = math.exp %90 : vector<8x256xf32>
    %cst_44 = arith.constant 1.000000e+00 : f32
    %92 = vector.broadcast %cst_44 : f32 to vector<8x256xf32>
    %93 = arith.addf %92, %91 : vector<8x256xf32>
    %94 = arith.divf %92, %93 : vector<8x256xf32>
    %cst_45 = arith.constant dense<0.000000e+00> : vector<16x256xf32>
    %95 = tpu.matmul %15, %94, %cst_45 {dimension_numbers = #tpu.dot_dimension_numbers<[1], [0], [0], [1], [0, 0, 1, 1], [], []>} : vector<16x8xf32>, vector<8x256xf32>, vector<16x256xf32> -> vector<16x256xf32>
    %96 = arith.mulf %60, %95 : vector<16x256xf32>
    %c0_46 = arith.constant 0 : index
    %c0_47 = arith.constant 0 : index
    %c0_48 = arith.constant 0 : index
    %97 = vector.load %arg8[%c0_46, %c0_47, %c0_48] : memref<2x16x256xf32, #tpu.memory_space<vmem>>, vector<1x16x256xf32>
    %98 = vector.shape_cast %97 : vector<1x16x256xf32> to vector<16x256xf32>
    %99 = vector.shape_cast %96 : vector<16x256xf32> to vector<1x16x256xf32>
    tpu.vector_store %arg8[%c0_46, %c0_47, %c0_48], %99 {strides = array<i32>} : memref<2x16x256xf32, #tpu.memory_space<vmem>>, vector<1x16x256xf32>,
    %100 = vector.extract_strided_slice %0 {offsets = [1, 0, 0], sizes = [1, 16, 256], strides = [1, 1, 1]} : vector<2x16x256xf32> to vector<1x16x256xf32>
    %101 = vector.shape_cast %100 : vector<1x16x256xf32> to vector<16x256xf32>
    %cst_49 = arith.constant dense<0.000000e+00> : vector<16xf32>
    %102 = vector.multi_reduction <add>, %101, %cst_49 [1] : vector<16x256xf32> to vector<16xf32>
    %103 = vector.shape_cast %102 : vector<16xf32> to vector<16x1xf32>
    %cst_50 = arith.constant 3.906250e-03 : f32
    %104 = vector.broadcast %cst_50 : f32 to vector<16x1xf32>
    %105 = arith.mulf %103, %104 : vector<16x1xf32>
    %106 = vector.broadcast %105 : vector<16x1xf32> to vector<16x256xf32>
    %107 = arith.mulf %101, %106 : vector<16x256xf32>
    %cst_51 = arith.constant dense<0.000000e+00> : vector<8x256xf32>
    %108 = tpu.matmul %14, %107, %cst_51 {dimension_numbers = #tpu.dot_dimension_numbers<[1], [0], [0], [1], [0, 0, 1, 1], [], []>} : vector<8x16xf32>, vector<16x256xf32>, vector<8x256xf32> -> vector<8x256xf32>
    %cst_52 = arith.constant dense<0.000000e+00> : vector<8xf32>
    %109 = vector.multi_reduction <add>, %108, %cst_52 [1] : vector<8x256xf32> to vector<8xf32>
    %110 = vector.shape_cast %109 : vector<8xf32> to vector<8x1xf32>
    %cst_53 = arith.constant 3.906250e-03 : f32
    %111 = vector.broadcast %cst_53 : f32 to vector<8x1xf32>
    %112 = arith.mulf %110, %111 : vector<8x1xf32>
    %113 = vector.broadcast %112 : vector<8x1xf32> to vector<8x256xf32>
    %114 = arith.subf %108, %113 : vector<8x256xf32>
    %115 = arith.mulf %114, %114 : vector<8x256xf32>
    %cst_54 = arith.constant dense<0.000000e+00> : vector<8xf32>
    %116 = vector.multi_reduction <add>, %115, %cst_54 [1] : vector<8x256xf32> to vector<8xf32>
    %117 = vector.shape_cast %116 : vector<8xf32> to vector<8x1xf32>
    %cst_55 = arith.constant 0.00392156886 : f32
    %118 = vector.broadcast %cst_55 : f32 to vector<8x1xf32>
    %119 = arith.mulf %117, %118 : vector<8x1xf32>
    %120 = math.sqrt %119 : vector<8x1xf32>
    %cst_56 = arith.constant 9.99999974E-6 : f32
    %121 = vector.broadcast %cst_56 : f32 to vector<8x1xf32>
    %122 = arith.addf %120, %121 : vector<8x1xf32>
    %cst_57 = arith.constant 1.000000e+00 : f32
    %123 = vector.broadcast %cst_57 : f32 to vector<8x1xf32>
    %124 = arith.divf %123, %122 : vector<8x1xf32>
    %125 = vector.broadcast %124 : vector<8x1xf32> to vector<8x256xf32>
    %126 = arith.mulf %114, %125 : vector<8x256xf32>
    %127 = vector.broadcast %16 : vector<8x1xf32> to vector<8x256xf32>
    %128 = arith.mulf %126, %127 : vector<8x256xf32>
    %129 = vector.broadcast %17 : vector<8x1xf32> to vector<8x256xf32>
    %130 = arith.addf %128, %129 : vector<8x256xf32>
    %131 = arith.negf %130 : vector<8x256xf32>
    %132 = math.exp %131 : vector<8x256xf32>
    %cst_58 = arith.constant 1.000000e+00 : f32
    %133 = vector.broadcast %cst_58 : f32 to vector<8x256xf32>
    %134 = arith.addf %133, %132 : vector<8x256xf32>
    %135 = arith.divf %133, %134 : vector<8x256xf32>
    %cst_59 = arith.constant dense<0.000000e+00> : vector<16x256xf32>
    %136 = tpu.matmul %15, %135, %cst_59 {dimension_numbers = #tpu.dot_dimension_numbers<[1], [0], [0], [1], [0, 0, 1, 1], [], []>} : vector<16x8xf32>, vector<8x256xf32>, vector<16x256xf32> -> vector<16x256xf32>
    %137 = arith.mulf %101, %136 : vector<16x256xf32>
    %c1 = arith.constant 1 : index
    %c0_60 = arith.constant 0 : index
    %c0_61 = arith.constant 0 : index
    %138 = vector.load %arg7[%c1, %c0_60, %c0_61] : memref<2x16x256xf32, #tpu.memory_space<vmem>>, vector<1x16x256xf32>
    %139 = vector.shape_cast %138 : vector<1x16x256xf32> to vector<16x256xf32>
    %140 = vector.shape_cast %137 : vector<16x256xf32> to vector<1x16x256xf32>
    tpu.vector_store %arg7[%c1, %c0_60, %c0_61], %140 {strides = array<i32>} : memref<2x16x256xf32, #tpu.memory_space<vmem>>, vector<1x16x256xf32>,
    %141 = vector.extract_strided_slice %1 {offsets = [1, 0, 0], sizes = [1, 16, 256], strides = [1, 1, 1]} : vector<2x16x256xf32> to vector<1x16x256xf32>
    %142 = vector.shape_cast %141 : vector<1x16x256xf32> to vector<16x256xf32>
    %cst_62 = arith.constant dense<0.000000e+00> : vector<16xf32>
    %143 = vector.multi_reduction <add>, %142, %cst_62 [1] : vector<16x256xf32> to vector<16xf32>
    %144 = vector.shape_cast %143 : vector<16xf32> to vector<16x1xf32>
    %cst_63 = arith.constant 3.906250e-03 : f32
    %145 = vector.broadcast %cst_63 : f32 to vector<16x1xf32>
    %146 = arith.mulf %144, %145 : vector<16x1xf32>
    %147 = vector.broadcast %146 : vector<16x1xf32> to vector<16x256xf32>
    %148 = arith.mulf %142, %147 : vector<16x256xf32>
    %cst_64 = arith.constant dense<0.000000e+00> : vector<8x256xf32>
    %149 = tpu.matmul %14, %148, %cst_64 {dimension_numbers = #tpu.dot_dimension_numbers<[1], [0], [0], [1], [0, 0, 1, 1], [], []>} : vector<8x16xf32>, vector<16x256xf32>, vector<8x256xf32> -> vector<8x256xf32>
    %cst_65 = arith.constant dense<0.000000e+00> : vector<8xf32>
    %150 = vector.multi_reduction <add>, %149, %cst_65 [1] : vector<8x256xf32> to vector<8xf32>
    %151 = vector.shape_cast %150 : vector<8xf32> to vector<8x1xf32>
    %cst_66 = arith.constant 3.906250e-03 : f32
    %152 = vector.broadcast %cst_66 : f32 to vector<8x1xf32>
    %153 = arith.mulf %151, %152 : vector<8x1xf32>
    %154 = vector.broadcast %153 : vector<8x1xf32> to vector<8x256xf32>
    %155 = arith.subf %149, %154 : vector<8x256xf32>
    %156 = arith.mulf %155, %155 : vector<8x256xf32>
    %cst_67 = arith.constant dense<0.000000e+00> : vector<8xf32>
    %157 = vector.multi_reduction <add>, %156, %cst_67 [1] : vector<8x256xf32> to vector<8xf32>
    %158 = vector.shape_cast %157 : vector<8xf32> to vector<8x1xf32>
    %cst_68 = arith.constant 0.00392156886 : f32
    %159 = vector.broadcast %cst_68 : f32 to vector<8x1xf32>
    %160 = arith.mulf %158, %159 : vector<8x1xf32>
    %161 = math.sqrt %160 : vector<8x1xf32>
    %cst_69 = arith.constant 9.99999974E-6 : f32
    %162 = vector.broadcast %cst_69 : f32 to vector<8x1xf32>
    %163 = arith.addf %161, %162 : vector<8x1xf32>
    %cst_70 = arith.constant 1.000000e+00 : f32
    %164 = vector.broadcast %cst_70 : f32 to vector<8x1xf32>
    %165 = arith.divf %164, %163 : vector<8x1xf32>
    %166 = vector.broadcast %165 : vector<8x1xf32> to vector<8x256xf32>
    %167 = arith.mulf %155, %166 : vector<8x256xf32>
    %168 = vector.broadcast %16 : vector<8x1xf32> to vector<8x256xf32>
    %169 = arith.mulf %167, %168 : vector<8x256xf32>
    %170 = vector.broadcast %17 : vector<8x1xf32> to vector<8x256xf32>
    %171 = arith.addf %169, %170 : vector<8x256xf32>
    %172 = arith.negf %171 : vector<8x256xf32>
    %173 = math.exp %172 : vector<8x256xf32>
    %cst_71 = arith.constant 1.000000e+00 : f32
    %174 = vector.broadcast %cst_71 : f32 to vector<8x256xf32>
    %175 = arith.addf %174, %173 : vector<8x256xf32>
    %176 = arith.divf %174, %175 : vector<8x256xf32>
    %cst_72 = arith.constant dense<0.000000e+00> : vector<16x256xf32>
    %177 = tpu.matmul %15, %176, %cst_72 {dimension_numbers = #tpu.dot_dimension_numbers<[1], [0], [0], [1], [0, 0, 1, 1], [], []>} : vector<16x8xf32>, vector<8x256xf32>, vector<16x256xf32> -> vector<16x256xf32>
    %178 = arith.mulf %142, %177 : vector<16x256xf32>
    %c1_73 = arith.constant 1 : index
    %c0_74 = arith.constant 0 : index
    %c0_75 = arith.constant 0 : index
    %179 = vector.load %arg8[%c1_73, %c0_74, %c0_75] : memref<2x16x256xf32, #tpu.memory_space<vmem>>, vector<1x16x256xf32>
    %180 = vector.shape_cast %179 : vector<1x16x256xf32> to vector<16x256xf32>
    %181 = vector.shape_cast %178 : vector<16x256xf32> to vector<1x16x256xf32>
    tpu.vector_store %arg8[%c1_73, %c0_74, %c0_75], %181 {strides = array<i32>} : memref<2x16x256xf32, #tpu.memory_space<vmem>>, vector<1x16x256xf32>,
    return
  }
  func.func @transform_0(%arg0: i32) -> (i32, i32, i32) {
    %c0_i32 = arith.constant 0 : i32
    %c0_i32_0 = arith.constant 0 : i32
    %c0_i32_1 = arith.constant 0 : i32
    return %arg0, %c0_i32, %c0_i32_0 : i32, i32, i32
  }
  func.func @transform_1(%arg0: i32) -> (i32, i32, i32) {
    %c0_i32 = arith.constant 0 : i32
    %c0_i32_0 = arith.constant 0 : i32
    %c0_i32_1 = arith.constant 0 : i32
    return %arg0, %c0_i32, %c0_i32_0 : i32, i32, i32
  }
  func.func @transform_2(%arg0: i32) -> (i32, i32) {
    %c0_i32 = arith.constant 0 : i32
    %c0_i32_0 = arith.constant 0 : i32
    %c0_i32_1 = arith.constant 0 : i32
    return %c0_i32, %c0_i32_0 : i32, i32
  }
  func.func @transform_3(%arg0: i32) -> (i32, i32) {
    %c0_i32 = arith.constant 0 : i32
    %c0_i32_0 = arith.constant 0 : i32
    %c0_i32_1 = arith.constant 0 : i32
    return %c0_i32, %c0_i32_0 : i32, i32
  }
  func.func @transform_4(%arg0: i32) -> (i32, i32) {
    %c0_i32 = arith.constant 0 : i32
    %c0_i32_0 = arith.constant 0 : i32
    %c0_i32_1 = arith.constant 0 : i32
    return %c0_i32, %c0_i32_0 : i32, i32
  }
  func.func @transform_5(%arg0: i32) -> (i32, i32) {
    %c0_i32 = arith.constant 0 : i32
    %c0_i32_0 = arith.constant 0 : i32
    %c0_i32_1 = arith.constant 0 : i32
    return %c0_i32, %c0_i32_0 : i32, i32
  }
  func.func @transform_6(%arg0: i32) -> (i32, i32, i32) {
    %c0_i32 = arith.constant 0 : i32
    %c0_i32_0 = arith.constant 0 : i32
    %c0_i32_1 = arith.constant 0 : i32
    return %arg0, %c0_i32, %c0_i32_0 : i32, i32, i32
  }
  func.func @transform_7(%arg0: i32) -> (i32, i32, i32) {
    %c0_i32 = arith.constant 0 : i32
    %c0_i32_0 = arith.constant 0 : i32
    %c0_i32_1 = arith.constant 0 : i32
    return %arg0, %c0_i32, %c0_i32_0 : i32, i32, i32
  }
  func.func @transform_8(%arg0: i32) -> (i32, i32, i32) {
    %c0_i32 = arith.constant 0 : i32
    %c0_i32_0 = arith.constant 0 : i32
    %c0_i32_1 = arith.constant 0 : i32
    return %arg0, %c0_i32, %c0_i32_0 : i32, i32, i32
  }
}

</mosaic_0001>

<bundles_post_ra>
// kernel: spatail_cell_forward.3
= control target key start
LH: loop header
LB: loop body
LE: loop exit
PB: predicated region body
PF: predicated region fallthrough
CT: control target
= control target key end

     0   :  { %s223_s0 = inlined_call_operand.vmem [shape: f32[2,64], index: 0, kind: input, shape index: {}]   ;;  %s224_s1 = inlined_call_operand.vmem [shape: f32[64,32], index: 1, kind: input, shape index: {}]   ;;  %s225_s2 = inlined_call_operand.vmem [shape: f32[1,32], index: 2, kind: input, shape index: {}]   ;;  %s226_s3 = inlined_call_operand.vmem [shape: f32[32,4], index: 3, kind: input, shape index: {}]   ;;  %s227_s4 = inlined_call_operand.vmem [shape: f32[1,4], index: 4, kind: input, shape index: {}]   ;;  %s228_s5 = inlined_call_operand.hbm [shape: f32[2,4], index: 5, kind: output, shape index: {}]  }
   0x1   :  { %v29_v0 = vld [vmem:[%s224_s1 + $0x38] sm:$0xff]  ;;  %v28_v1 = vld [vmem:[%s224_s1 + $0x30] sm:$0xff]  ;;  %v27_v2 = vld [vmem:[%s224_s1 + $0x28] sm:$0xff] }
   0x2   :  { %46 = vmatpush.msra.mxu0 %v29_v0  ;;  %v62_v3 = vld [vmem:[%s226_s3 + $0x18] sm:$0xff]  ;;  %v26_v4 = vld [vmem:[%s224_s1 + $0x20] sm:$0xff] }
   0x3   :  { %83 = vmatpush.msra.mxu1 %v62_v3 }
   0x4   :  { %47 = vmatpush.msra.mxu0 %v28_v1 }
   0x5   :  { %10 = vsyncpa [#allocation3], 0  ;;  %v25_v5 = vld [vmem:[%s224_s1 + $0x18] sm:$0xff]  ;;  %v24_v6 = vld [vmem:[%s224_s1 + $0x10] sm:$0xff]  ;;  %vm34_vm0 = vcmask 523264   ;;  %vm67_vm1 = vcmask 261120  }
   0x6   :  { %48 = vmatpush.msra.mxu0 %v27_v2  ;;  %v23_v7 = vld [vmem:[%s224_s1 + $0x8] sm:$0xff]  ;;  %v22_v8 = vld [vmem:[%s224_s1] sm:$0xff]  ;;  %v61_v10 = vld [vmem:[%s226_s3 + $0x10] sm:$0xff]  ;;  %s144_s21 = smov [#allocation2]   ;;  %s102_s24 = sshll.u32 %s228_s5, 4  ;;  %vm93_vm2 = vcmask 25600   ;;  %s103_s24 = int_to_ptr.hbm [resolvable:$true] %s102_s24 }
   0x7   :  { %v21_v9 = vld [vmem:[%s223_s0] sm:$0x3]  ;;  %84 = vmatpush.msra.mxu1 %v61_v10  ;;  %v60_v11 = vld [vmem:[%s226_s3 + $0x8] sm:$0xff]  ;;  %s100_s22 = sshll.u32 %s144_s21, 4  ;;  %s101_s22 = int_to_ptr.vmem [resolvable:$true] %s100_s22 }
   0x8   :  { %49 = vmatpush.msra.mxu0 %v26_v4  ;;  %v59_v12 = vld [vmem:[%s226_s3] sm:$0xff] }
   0x9   :  { %85 = vmatpush.msra.mxu1 %v60_v11  ;;  %v114_v13 = vld [vmem:[%s225_s2] ss:$0 sm:$0xff] }
   0xa   :  { %50 = vmatpush.msra.mxu0 %v25_v5  ;;  %v115_v17 = vld [vmem:[%s227_s4] ss:$0 sm:$0xff] }
   0xb   :  { %86 = vmatpush.msra.mxu1 %v59_v12 }
   0xc   :  { %51 = vmatpush.msra.mxu0 %v24_v6 }
   0xe   :  { %52 = vmatpush.msra.mxu0 %v23_v7 }
  0x10   :  { %53 = vmatpush.msra.mxu0 %v22_v8 }
  0x11   :  { %111 = vmatmul.msk.f32.vlgmr.msra.gmra.mxu0 %vm34_vm0, %v21_v9 }
  0x8e   :  { %v55_v14 = vpop.f32.mrf.mxu0 }
  0x8f   :  { %v56_v15 = vadd.f32 %v114_v13, %v55_v14 }
  0x91   :  { %v58_v16 = vmax.f32 %v56_v15, 0.0 }
  0x93   :  { %112 = vmatmul.msk.f32.vlgmr.msra.gmra.mxu1 %vm67_vm1, %v58_v16 }
 0x110   :  { %v88_v18 = vpop.f32.mrf.mxu1 }
 0x111   :  { %v89_v19 = vadd.f32 %v115_v17, %v88_v18 }
 0x113   :  { %116 = vtanh.f32 %v89_v19 }
 0x119   :  { %v117_v20 = vpop.eup %116 }
 0x11a   :  { %v92_v21 = vmax.f32 %v117_v20, 0.0 }
 0x11c   :  { %94 = vst.msk [vmem:[#allocation2] sm:$0x3] %vm93_vm2, %v92_v21 }
 0x11d   :  { %105 = dma.vmem_to_hbm [thread:$0]  %s101_s22, 32, %s103_s24, [#allocation3]  }
 0x11e   :  { %142 = dma.done.wait [#allocation3], 32  }
 0x11f   :  { %143 = vsyncadd [#allocation3], 4294967264 }
 0x120   :  { %110 = vsyncpa [#allocation3], 1 }

// kernel: spatail_cell_forward.2
= control target key start
LH: loop header
LB: loop body
LE: loop exit
PB: predicated region body
PF: predicated region fallthrough
CT: control target
= control target key end

     0   :  { %v102_v6 = vlaneseq  ;;  %vm138_vm0 = vcmask 392512   ;;  %vm160_vm1 = vcmask 130048   ;;  %v1032_v27 = vmov 0   ;;  %s1443_s0 = inlined_call_operand.vmem [shape: f32[2,16,256], index: 0, kind: input, shape index: {}]   ;;  %s1444_s2 = inlined_call_operand.vmem [shape: f32[8,16], index: 2, kind: input, shape index: {}]   ;;  %s1445_s4 = inlined_call_operand.vmem [shape: f32[8,1], index: 4, kind: input, shape index: {}]   ;;  %s1446_s1 = inlined_call_operand.vmem [shape: f32[2,16,256], index: 1, kind: input, shape index: {}]   ;;  %s1447_s5 = inlined_call_operand.vmem [shape: f32[8,1], index: 5, kind: input, shape index: {}]   ;;  %s1448_s3 = inlined_call_operand.vmem [shape: f32[16,8], index: 3, kind: input, shape index: {}]   ;;  %s1449_s6 = inlined_call_operand.vmem [shape: f32[2,16,256], index: 6, kind: output, shape index: {0}]   ;;  %s1450_s7 = inlined_call_operand.vmem [shape: f32[2,16,256], index: 7, kind: output, shape index: {1}]   ;;  %s1451_s8 = inlined_call_operand.vmem [shape: f32[2,1,64], index: 8, kind: output, shape index: {2}]  }
   0x1   :  { %v1081_v0 = vld [vmem:[%s1443_s0 + $0x10] sm:$0xff]  ;;  %v1086_v1 = vld [vmem:[%s1443_s0 + $0x18] sm:$0xff]  ;;  %v1093_v3 = vld [vmem:[%s1443_s0] sm:$0xff]  ;;  %982 = vset.pattern.permute.xlu2 %v1032_v27  ;;  %983 = vset.pattern.permute.xlu0 %v1032_v27  ;;  %vm153_vm8 = vcmask 523712   ;;  %vm318_vm14 = vcmask 64512  }
   0x2   :  { %v69_v2 = vadd.f32 %v1086_v1, %v1081_v0  ;;  %v1098_v4 = vld [vmem:[%s1443_s0 + $0x8] sm:$0xff]  ;;  %v1102_v9 = vand.u32 127, %v102_v6  ;;  %v1119_v20 = vld [vmem:[%s1444_s2] sm:$0xff]  ;;  %v1134_v26 = vld [vmem:[%s1446_s1 + $0x10] sm:$0xff] }
   0x3   :  { %v66_v5 = vadd.f32 %v1098_v4, %v1093_v3  ;;  %v175_v25 = vld [vmem:[%s1445_s4] sm:$0xff]  ;;  %v1139_v28 = vld [vmem:[%s1446_s1 + $0x18] sm:$0xff]  ;;  %v1154_v39 = vld [vmem:[%s1446_s1 + $0x8] sm:$0xff] }
   0x4   :  { %70 = vadd.xlane.f32.xlu0 %v69_v2  ;;  %v1107_v12 = vadd.s32 4294967256, %v1102_v9  ;;  %v1110_v13 = vadd.s32 4294967264, %v1102_v9  ;;  %268 = vperm.xlu2 %982, %v175_v25   ;;  %v85_v29 = vadd.f32 %v1139_v28, %v1134_v26  ;;  %v176_v30 = vld [vmem:[%s1447_s5] sm:$0xff] }
   0x5   :  { %v1149_v38 = vld [vmem:[%s1446_s1] sm:$0xff] }
   0x6   :  { %v82_v40 = vadd.f32 %v1154_v39, %v1149_v38 }
   0xc   :  { %67 = vadd.xlane.f32.xlu0 %v66_v5  ;;  %275 = vperm.xlu2 %982, %v176_v30  }
  0x14   :  { %86 = vadd.xlane.f32.xlu0 %v85_v29 }
  0x5e   :  { %v1158_v57 = vpop.permute.xlu2 %268 }
  0x77   :  { %v71_v7 = vpop.xlane.xlu0 %70 }
  0x78   :  { %v79_v8 = vmul.f32 0.00390625, %v71_v7 }
  0x7a   :  { %v179_v10 = vmul.f32 %v79_v8, %v1081_v0  ;;  %v180_v11 = vmul.f32 %v79_v8, %v1086_v1  ;;  %v137_v16 = vperm.slane %v79_v8, %v1107_v12 }
  0x7c   :  { %198 = vmatpush.msra.mxu0 %v179_v10  ;;  %218 = vmatpush.msra.mxu1 %v180_v11  ;;  %v1162_v10 = vpop.permute.xlu2 %275 }
  0x7f   :  { %v68_v14 = vpop.xlane.xlu0 %67 }
  0x80   :  { %v78_v15 = vmul.f32 0.00390625, %v68_v14 }
  0x82   :  { %v135_v17 = vperm.slane %v78_v15, %v1110_v13  ;;  %v177_v18 = vmul.f32 %v78_v15, %v1093_v3  ;;  %v178_v19 = vmul.f32 %v78_v15, %v1098_v4  ;;  %v1167_v15 = vadd.s32 4294967248, %v1102_v9 }
  0x84   :  { %v1122_v21 = vsel %vm138_vm0, %v137_v16, %v135_v17  ;;  %199 = vmatpush.msra.mxu0 %v177_v18  ;;  %219 = vmatpush.msra.mxu1 %v178_v19  ;;  %v1170_v17 = vadd.s32 4294967240, %v1102_v9 }
  0x85   :  { %939 = vmatmul.msk.f32.vlgmr.msra.gmra.mxu0 %vm160_vm1, %v1119_v20  ;;  %940 = vmatmul.msk.f32.vlgmr.msra.gmra.mxu1 %vm160_vm1, %v1119_v20 }
  0x87   :  { %v87_v18 = vpop.xlane.xlu0 %86 }
 0x102   :  { %v201_v22 = vpop.f32.mrf.mxu0  ;;  %v221_v23 = vpop.f32.mrf.mxu1 }
 0x103   :  { %v224_v24 = vadd.f32 %v221_v23, %v201_v22 }
 0x105   :  { %225 = vadd.xlane.f32.xlu1 %v224_v24 }
 0x178   :  { %v226_v31 = vpop.xlane.xlu1 %225 }
 0x179   :  { %v227_v32 = vmul.f32 0.00390625, %v226_v31 }
 0x17b   :  { %v228_v33 = vsub.f32 %v201_v22, %v227_v32  ;;  %v229_v34 = vsub.f32 %v221_v23, %v227_v32  ;;  %v95_v22 = vmul.f32 0.00390625, %v87_v18  ;;  %v1217_v18 = vld [vmem:[%s1443_s0 + $0x30] sm:$0xff] }
 0x17d   :  { %v230_v35 = vmul.f32 %v228_v33, %v228_v33  ;;  %v231_v36 = vmul.f32 %v229_v34, %v229_v34  ;;  %v152_v27 = vperm.slane %v95_v22, %v1170_v17 }
 0x17f   :  { %v232_v37 = vadd.f32 %v231_v36, %v230_v35 }
 0x181   :  { %233 = vadd.xlane.f32.xlu1 %v232_v37 }
 0x189   :  { %83 = vadd.xlane.f32.xlu1 %v82_v40 }
 0x1f4   :  { %v234_v41 = vpop.xlane.xlu1 %233 }
 0x1f5   :  { %v235_v42 = vmul.f32 0.003921569, %v234_v41 }
 0x1f7   :  { %984 = vrsqrt.f32 %v235_v42  ;;  %vm243_vm2 = vcmp.eq.f32.partialorder %v235_v42, inf  ;;  %v246_v50 = vand.u32 2147483648, %v235_v42  ;;  %vm245_vm3 = vcmp.eq.f32.partialorder %v235_v42, 0.0 }
 0x1fc   :  { %v84_v16 = vpop.xlane.xlu1 %83 }
 0x1fd   :  { %v985_v43 = vpop.eup %984  ;;  %v94_v19 = vmul.f32 0.00390625, %v84_v16 }
 0x1fe   :  { %v237_v44 = vmul.f32 %v985_v43, %v235_v42 }
 0x1ff   :  { %v150_v25 = vperm.slane %v94_v19, %v1167_v15 }
 0x200   :  { %v238_v45 = vmul.f32 %v985_v43, %v237_v44 }
 0x201   :  { %v1175_v29 = vsel %vm153_vm8, %v152_v27, %v150_v25 }
 0x202   :  { %v239_v46 = vmul.f32 0.5, %v238_v45 }
 0x204   :  { %v240_v47 = vsub.f32 1.5, %v239_v46 }
 0x206   :  { %v241_v48 = vmul.f32 %v985_v43, %v240_v47 }
 0x208   :  { %v242_v49 = vmul.f32 %v241_v48, %v235_v42 }
 0x20a   :  { %v244_v51 = vsel %vm243_vm2, %v235_v42, %v242_v49 }
 0x20b   :  { %v247_v52 = vsel %vm245_vm3, %v246_v50, %v244_v51 }
 0x20c   :  { %v248_v53 = vadd.f32 1e-05, %v247_v52 }
 0x20e   :  { %986 = vrcp.f32 %v248_v53  ;;  %v260_v58 = vand.u32 2147483648, %v248_v53  ;;  %v258_v60 = vand.u32 2147483647, %v248_v53  ;;  %vm254_vm5 = vweird.f32 %v248_v53 }
 0x210   :  { %v261_v62 = vor.u32 1.1754944e-38, %v260_v58  ;;  %vm259_vm7 = vcmp.eq.f32.partialorder %v258_v60, 8.507059e+37  ;;  %v382_v58 = vmul.f32 %v95_v22, %v1139_v28  ;;  %v379_v60 = vmul.f32 %v94_v19, %v1149_v38 }
 0x214   :  { %v987_v54 = vpop.eup %986 }
 0x215   :  { %v250_v55 = vmul.f32 %v987_v54, %v248_v53  ;;  %vm255_vm4 = vweird.f32 %v987_v54  ;;  %v381_v53 = vmul.f32 %v95_v22, %v1134_v26 }
 0x216   :  { %vm256_vm6 = vmor %vm254_vm5, %vm255_vm4  ;;  %vm112_vm4 = vcmask 1041409  }
 0x217   :  { %v251_v56 = vsub.f32 1.0, %v250_v55 }
 0x219   :  { %v252_v59 = vmul.f32 %v987_v54, %v251_v56  ;;  %v1181_v56 = vld [vmem:[%s1448_s3] sm:$0xff] }
 0x21b   :  { %v253_v61 = vadd.f32 %v987_v54, %v252_v59 }
 0x21d   :  { %v257_v63 = vsel %vm256_vm6, %v987_v54, %v253_v61  ;;  %v380_v61 = vmul.f32 %v94_v19, %v1154_v39  ;;  %v1222_v19 = vld [vmem:[%s1443_s0 + $0x38] sm:$0xff] }
 0x21e   :  { %v262_v2 = vsel %vm259_vm7, %v261_v62, %v257_v63  ;;  %v75_v22 = vadd.f32 %v1222_v19, %v1217_v18 }
 0x21f   :  { %v264_v5 = vmul.f32 %v262_v2, %v228_v33  ;;  %v265_v6 = vmul.f32 %v262_v2, %v229_v34 }
 0x221   :  { %v271_v7 = vmul.f32 %v1158_v57, %v264_v5  ;;  %v272_v8 = vmul.f32 %v1158_v57, %v265_v6 }
 0x223   :  { %v278_v11 = vadd.f32 %v1162_v10, %v271_v7  ;;  %v279_v14 = vadd.f32 %v1162_v10, %v272_v8 }
 0x225   :  { %v941_v23 = vmul.f32 -1.442695, %v278_v11  ;;  %v942_v24 = vmul.f32 -1.442695, %v279_v14  ;;  %v1205_v11 = vld [vmem:[%s1446_s1 + $0x30] sm:$0xff]  ;;  %v1210_v14 = vld [vmem:[%s1446_s1 + $0x38] sm:$0xff] }
 0x226   :  { %v91_v16 = vadd.f32 %v1210_v14, %v1205_v11 }
 0x227   :  { %988 = vpow2.f32 %v941_v23 }
 0x228   :  { %990 = vpow2.f32 %v942_v24  ;;  %92 = vadd.xlane.f32.xlu1 %v91_v16 }
 0x22d   :  { %v989_v30 = vpop.eup %988 }
 0x22e   :  { %v991_v31 = vpop.eup %990  ;;  %v286_v32 = vadd.f32 1.0, %v989_v30 }
 0x22f   :  { %v287_v33 = vadd.f32 1.0, %v991_v31 }
 0x230   :  { %992 = vrcp.f32 %v286_v32  ;;  %v299_v41 = vand.u32 2147483648, %v286_v32  ;;  %v297_v44 = vand.u32 2147483647, %v286_v32  ;;  %vm293_vm11 = vweird.f32 %v286_v32  ;;  %76 = vadd.xlane.f32.xlu1 %v75_v22 }
 0x231   :  { %994 = vrcp.f32 %v287_v33  ;;  %v314_v45 = vand.u32 2147483648, %v287_v33  ;;  %v312_v47 = vand.u32 2147483647, %v287_v33  ;;  %vm308_vm13 = vweird.f32 %v287_v33 }
 0x232   :  { %v300_v49 = vor.u32 1.1754944e-38, %v299_v41  ;;  %vm298_vm15 = vcmp.eq.f32.partialorder %v297_v44, 8.507059e+37 }
 0x233   :  { %v315_v52 = vor.u32 1.1754944e-38, %v314_v45  ;;  %vm313_vm3 = vcmp.eq.f32.partialorder %v312_v47, 8.507059e+37 }
 0x236   :  { %v993_v34 = vpop.eup %992 }
 0x237   :  { %v995_v35 = vpop.eup %994  ;;  %v289_v36 = vmul.f32 %v993_v34, %v286_v32  ;;  %vm294_vm9 = vweird.f32 %v993_v34 }
 0x238   :  { %v304_v37 = vmul.f32 %v995_v35, %v287_v33  ;;  %vm309_vm10 = vweird.f32 %v995_v35  ;;  %vm295_vm12 = vmor %vm293_vm11, %vm294_vm9  ;;  %v1237_v33 = vld [vmem:[%s1446_s1 + $0x20] sm:$0xff] }
 0x239   :  { %v290_v40 = vsub.f32 1.0, %v289_v36  ;;  %vm310_vm2 = vmor %vm308_vm13, %vm309_vm10  ;;  %v1249_v36 = vld [vmem:[%s1443_s0 + $0x20] sm:$0xff] }
 0x23a   :  { %v305_v42 = vsub.f32 1.0, %v304_v37  ;;  %v1254_v37 = vld [vmem:[%s1443_s0 + $0x28] sm:$0xff] }
 0x23b   :  { %v291_v43 = vmul.f32 %v993_v34, %v290_v40  ;;  %v72_v40 = vadd.f32 %v1254_v37, %v1249_v36 }
 0x23c   :  { %v306_v46 = vmul.f32 %v995_v35, %v305_v42 }
 0x23d   :  { %v292_v48 = vadd.f32 %v993_v34, %v291_v43 }
 0x23e   :  { %v307_v50 = vadd.f32 %v995_v35, %v306_v46  ;;  %v1263_v46 = vld [vmem:[%s1448_s3 + $0x8] sm:$0xff] }
 0x23f   :  { %v296_v51 = vsel %vm295_vm12, %v993_v34, %v292_v48  ;;  %v1242_v34 = vld [vmem:[%s1446_s1 + $0x28] sm:$0xff] }
 0x240   :  { %v301_v54 = vsel %vm298_vm15, %v300_v49, %v296_v51  ;;  %v311_v55 = vsel %vm310_vm2, %v995_v35, %v307_v50  ;;  %v88_v35 = vadd.f32 %v1242_v34, %v1237_v33 }
 0x241   :  { %340 = vmatpush.msrb.mxu0 %v301_v54  ;;  %979 = vmatpush.msra.mxu2 %v301_v54  ;;  %v316_v59 = vsel %vm313_vm3, %v315_v52, %v311_v55 }
 0x242   :  { %363 = vmatpush.msrb.mxu1 %v316_v59  ;;  %980 = vmatpush.msra.mxu3 %v316_v59 }
 0x243   :  { %943 = vmatmul.msk.f32.vlgmr.msrb.gmra.mxu0 %vm318_vm14, %v1181_v56  ;;  %945 = vmatmul.msk.f32.vlgmr.msrb.gmra.mxu1 %vm318_vm14, %v1181_v56 }
 0x244   :  { %397 = vmatpush.msra.mxu0 %v381_v53  ;;  %417 = vmatpush.msra.mxu1 %v382_v58 }
 0x245   :  { %944 = vmatmul.msk.f32.vlgmr.msra.gmra.mxu2 %vm318_vm14, %v1263_v46  ;;  %946 = vmatmul.msk.f32.vlgmr.msra.gmra.mxu3 %vm318_vm14, %v1263_v46 }
 0x246   :  { %398 = vmatpush.msra.mxu0 %v379_v60  ;;  %418 = vmatpush.msra.mxu1 %v380_v61 }
 0x24b   :  { %947 = vmatmul.msk.f32.vlgmr.msra.gmra.mxu0 %vm160_vm1, %v1119_v20  ;;  %948 = vmatmul.msk.f32.vlgmr.msra.gmra.mxu1 %vm160_vm1, %v1119_v20 }
 0x29b   :  { %v93_v41 = vpop.xlane.xlu1 %92 }
 0x29c   :  { %v1269_v49 = vmul.f32 0.00390625, %v93_v41 }
 0x29e   :  { %v156_v52 = vperm.slane %v1269_v49, %v1170_v17 }
 0x2a3   :  { %v77_v42 = vpop.xlane.xlu1 %76 }
 0x2a4   :  { %v81_v43 = vmul.f32 0.00390625, %v77_v42 }
 0x2a6   :  { %v563_v44 = vmul.f32 %v81_v43, %v1217_v18  ;;  %v564_v45 = vmul.f32 %v81_v43, %v1222_v19 }
 0x2a8   :  { %579 = vmatpush.msrb.mxu0 %v563_v44  ;;  %599 = vmatpush.msrb.mxu1 %v564_v45 }
 0x2c0   :  { %v342_v62 = vpop.f32.mrf.mxu0  ;;  %v365_v63 = vpop.f32.mrf.mxu1 }
 0x2c1   :  { %v371_v2 = vmul.f32 %v342_v62, %v1093_v3  ;;  %v372_v5 = vmul.f32 %v365_v63, %v1098_v4 }
 0x2c3   :  { %375 = vst [vmem:[%s1449_s6] sm:$0xff] %v371_v2  ;;  %v141_v2 = vperm.slane %v81_v43, %v1107_v12 }
 0x2c4   :  { %376 = vst [vmem:[%s1449_s6 + $0x8] sm:$0xff] %v372_v5 }
 0x2c8   :  { %v400_v6 = vpop.f32.mrf.mxu0  ;;  %v420_v7 = vpop.f32.mrf.mxu1 }
 0x2c9   :  { %v423_v8 = vadd.f32 %v420_v7, %v400_v6 }
 0x2cb   :  { %424 = vadd.xlane.f32.xlu2 %v423_v8 }
 0x33e   :  { %v425_v23 = vpop.xlane.xlu2 %424 }
 0x33f   :  { %v426_v24 = vmul.f32 0.00390625, %v425_v23 }
 0x341   :  { %v1226_v25 = vsub.f32 %v400_v6, %v426_v24  ;;  %v1228_v27 = vsub.f32 %v420_v7, %v426_v24 }
 0x343   :  { %v429_v30 = vmul.f32 %v1226_v25, %v1226_v25  ;;  %v430_v31 = vmul.f32 %v1228_v27, %v1228_v27 }
 0x345   :  { %v431_v32 = vadd.f32 %v430_v31, %v429_v30 }
 0x347   :  { %432 = vadd.xlane.f32.xlu0 %v431_v32 }
 0x34f   :  { %89 = vadd.xlane.f32.xlu0 %v88_v35 }
 0x357   :  { %73 = vadd.xlane.f32.xlu0 %v72_v40 }
 0x3ba   :  { %v433_v47 = vpop.xlane.xlu0 %432 }
 0x3bb   :  { %v434_v48 = vmul.f32 0.003921569, %v433_v47 }
 0x3bd   :  { %996 = vrsqrt.f32 %v434_v48  ;;  %vm442_vm5 = vcmp.eq.f32.partialorder %v434_v48, inf  ;;  %v445_v16 = vand.u32 2147483648, %v434_v48  ;;  %vm444_vm6 = vcmp.eq.f32.partialorder %v434_v48, 0.0 }
 0x3c2   :  { %v90_v50 = vpop.xlane.xlu0 %89 }
 0x3c3   :  { %v997_v51 = vpop.eup %996  ;;  %v1273_v53 = vmul.f32 0.00390625, %v90_v50 }
 0x3c4   :  { %v436_v54 = vmul.f32 %v997_v51, %v434_v48 }
 0x3c5   :  { %v155_v55 = vperm.slane %v1273_v53, %v1167_v15 }
 0x3c6   :  { %v437_v58 = vmul.f32 %v997_v51, %v436_v54 }
 0x3c7   :  { %v157_v59 = vsel %vm153_vm8, %v156_v52, %v155_v55 }
 0x3c8   :  { %v438_v60 = vmul.f32 0.5, %v437_v58  ;;  %v1280_v61 = vsel %vm112_vm4, %v157_v59, %v1175_v29 }
 0x3ca   :  { %v439_v62 = vsub.f32 1.5, %v438_v60  ;;  %v74_v63 = vpop.xlane.xlu0 %73 }
 0x3cb   :  { %v80_v17 = vmul.f32 0.00390625, %v74_v63 }
 0x3cc   :  { %v440_v5 = vmul.f32 %v997_v51, %v439_v62 }
 0x3cd   :  { %v140_v6 = vperm.slane %v80_v17, %v1110_v13  ;;  %v561_v7 = vmul.f32 %v80_v17, %v1249_v36  ;;  %v562_v15 = vmul.f32 %v80_v17, %v1254_v37 }
 0x3ce   :  { %v441_v8 = vmul.f32 %v440_v5, %v434_v48 }
 0x3cf   :  { %v142_v22 = vsel %vm138_vm0, %v141_v2, %v140_v6  ;;  %580 = vmatpush.msrb.mxu0 %v561_v7  ;;  %600 = vmatpush.msrb.mxu1 %v562_v15 }
 0x3d0   :  { %v443_v29 = vsel %vm442_vm5, %v434_v48, %v441_v8  ;;  %955 = vmatmul.msk.f32.vlgmr.msrb.gmra.mxu0 %vm160_vm1, %v1119_v20  ;;  %956 = vmatmul.msk.f32.vlgmr.msrb.gmra.mxu1 %vm160_vm1, %v1119_v20  ;;  %v1293_v12 = vsel %vm112_vm4, %v142_v22, %v1122_v21 }
 0x3d1   :  { %v446_v13 = vsel %vm444_vm6, %v445_v16, %v443_v29 }
 0x3d2   :  { %v447_v23 = vadd.f32 1e-05, %v446_v13 }
 0x3d4   :  { %998 = vrcp.f32 %v447_v23  ;;  %v459_v32 = vand.u32 2147483648, %v447_v23  ;;  %v457_v40 = vand.u32 2147483647, %v447_v23  ;;  %vm453_vm7 = vweird.f32 %v447_v23 }
 0x3d6   :  { %v460_v42 = vor.u32 1.1754944e-38, %v459_v32  ;;  %vm458_vm9 = vcmp.eq.f32.partialorder %v457_v40, 8.507059e+37 }
 0x3da   :  { %v999_v24 = vpop.eup %998 }
 0x3db   :  { %v449_v30 = vmul.f32 %v999_v24, %v447_v23  ;;  %vm454_vm0 = vweird.f32 %v999_v24  ;;  %v746_v23 = vmul.f32 %v1269_v49, %v1205_v11 }
 0x3dc   :  { %vm455_vm8 = vmor %vm453_vm7, %vm454_vm0 }
 0x3dd   :  { %v450_v31 = vsub.f32 1.0, %v449_v30 }
 0x3df   :  { %v451_v35 = vmul.f32 %v999_v24, %v450_v31  ;;  %v747_v31 = vmul.f32 %v1269_v49, %v1210_v14  ;;  %v345_v49 = vpop.f32.mrf.mxu2 }
 0x3e1   :  { %v452_v41 = vadd.f32 %v999_v24, %v451_v35 }
 0x3e3   :  { %v456_v43 = vsel %vm455_vm8, %v999_v24, %v452_v41  ;;  %v744_v41 = vmul.f32 %v1273_v53, %v1237_v33 }
 0x3e4   :  { %v461_v44 = vsel %vm458_vm9, %v460_v42, %v456_v43  ;;  %v745_v42 = vmul.f32 %v1273_v53, %v1242_v34  ;;  %v368_v53 = vpop.f32.mrf.mxu3  ;;  %v373_v43 = vmul.f32 %v345_v49, %v1081_v0 }
 0x3e5   :  { %v463_v21 = vmul.f32 %v461_v44, %v1226_v25  ;;  %v464_v45 = vmul.f32 %v461_v44, %v1228_v27  ;;  %v374_v44 = vmul.f32 %v368_v53, %v1086_v1 }
 0x3e6   :  { %377 = vst [vmem:[%s1449_s6 + $0x10] sm:$0xff] %v373_v43 }
 0x3e7   :  { %v465_v47 = vmul.f32 %v463_v21, %v1158_v57  ;;  %v466_v48 = vmul.f32 %v464_v45, %v1158_v57  ;;  %378 = vst [vmem:[%s1449_s6 + $0x18] sm:$0xff] %v374_v44 }
 0x3e9   :  { %v467_v50 = vadd.f32 %v465_v47, %v1162_v10  ;;  %v468_v51 = vadd.f32 %v466_v48, %v1162_v10 }
 0x3eb   :  { %v949_v52 = vmul.f32 -1.442695, %v467_v50  ;;  %v950_v54 = vmul.f32 -1.442695, %v468_v51 }
 0x3ed   :  { %1000 = vpow2.f32 %v949_v52 }
 0x3ee   :  { %1002 = vpow2.f32 %v950_v54 }
 0x3f3   :  { %v1001_v55 = vpop.eup %1000 }
 0x3f4   :  { %v1003_v58 = vpop.eup %1002  ;;  %v475_v59 = vadd.f32 1.0, %v1001_v55 }
 0x3f5   :  { %v476_v60 = vadd.f32 1.0, %v1003_v58 }
 0x3f6   :  { %1004 = vrcp.f32 %v475_v59  ;;  %v488_v17 = vand.u32 2147483648, %v475_v59  ;;  %v486_v7 = vand.u32 2147483647, %v475_v59  ;;  %vm482_vm12 = vweird.f32 %v475_v59 }
 0x3f7   :  { %1006 = vrcp.f32 %v476_v60  ;;  %v503_v15 = vand.u32 2147483648, %v476_v60  ;;  %v501_v16 = vand.u32 2147483647, %v476_v60  ;;  %vm497_vm15 = vweird.f32 %v476_v60 }
 0x3f8   :  { %v489_v29 = vor.u32 1.1754944e-38, %v488_v17  ;;  %vm487_vm2 = vcmp.eq.f32.partialorder %v486_v7, 8.507059e+37  ;;  %v45_v7 = vmax.f32 %v1081_v0, %v1086_v1 }
 0x3f9   :  { %v504_v30 = vor.u32 1.1754944e-38, %v503_v15  ;;  %vm502_vm5 = vcmp.eq.f32.partialorder %v501_v16, 8.507059e+37  ;;  %v54_v15 = vmax.f32 %v1149_v38, %v1154_v39  ;;  %v63_v16 = vmax.f32 %v1205_v11, %v1210_v14 }
 0x3fa   :  { %46 = vmax.xlane.f32.xlu2 %v45_v7 }
 0x3fc   :  { %v1005_v25 = vpop.eup %1004 }
 0x3fd   :  { %v1007_v27 = vpop.eup %1006  ;;  %v478_v62 = vmul.f32 %v1005_v25, %v475_v59  ;;  %vm483_vm10 = vweird.f32 %v1005_v25 }
 0x3fe   :  { %v493_v63 = vmul.f32 %v1007_v27, %v476_v60  ;;  %vm498_vm11 = vweird.f32 %v1007_v27  ;;  %vm484_vm13 = vmor %vm482_vm12, %vm483_vm10 }
 0x3ff   :  { %v479_v2 = vsub.f32 1.0, %v478_v62  ;;  %vm499_vm3 = vmor %vm497_vm15, %vm498_vm11 }
 0x400   :  { %v494_v5 = vsub.f32 1.0, %v493_v63 }
 0x401   :  { %v480_v6 = vmul.f32 %v1005_v25, %v479_v2 }
 0x402   :  { %v495_v8 = vmul.f32 %v1007_v27, %v494_v5  ;;  %55 = vmax.xlane.f32.xlu2 %v54_v15 }
 0x403   :  { %v481_v22 = vadd.f32 %v1005_v25, %v480_v6 }
 0x404   :  { %v496_v13 = vadd.f32 %v1007_v27, %v495_v8  ;;  %v48_v8 = vmax.f32 %v1249_v36, %v1254_v37 }
 0x405   :  { %v485_v24 = vsel %vm484_vm13, %v1005_v25, %v481_v22  ;;  %v57_v22 = vmax.f32 %v1134_v26, %v1139_v28 }
 0x406   :  { %v490_v32 = vsel %vm487_vm2, %v489_v29, %v485_v24  ;;  %v500_v35 = vsel %vm499_vm3, %v1007_v27, %v496_v13  ;;  %v42_v24 = vmax.f32 %v1093_v3, %v1098_v4 }
 0x407   :  { %522 = vmatpush.msrb.mxu2 %v490_v32  ;;  %v505_v40 = vsel %vm502_vm5, %v504_v30, %v500_v35 }
 0x408   :  { %545 = vmatpush.msrb.mxu3 %v505_v40  ;;  %951 = vmatmul.msk.f32.vlgmr.msrb.gmra.mxu2 %vm318_vm14, %v1181_v56 }
 0x409   :  { %953 = vmatmul.msk.f32.vlgmr.msrb.gmra.mxu3 %vm318_vm14, %v1181_v56  ;;  %762 = vmatpush.msra.mxu2 %v746_v23 }
 0x40a   :  { %782 = vmatpush.msra.mxu3 %v747_v31  ;;  %64 = vmax.xlane.f32.xlu2 %v63_v16 }
 0x40b   :  { %763 = vmatpush.msra.mxu2 %v744_v41 }
 0x40c   :  { %783 = vmatpush.msra.mxu3 %v745_v42 }
 0x410   :  { %952 = vmatmul.msk.f32.gmra.mxu2 %vm318_vm14, %v1263_v46 }
 0x411   :  { %954 = vmatmul.msk.f32.gmra.mxu3 %vm318_vm14, %v1263_v46 }
 0x418   :  { %967 = vmatmul.msk.f32.vlgmr.msra.gmra.mxu2 %vm160_vm1, %v1119_v20 }
 0x419   :  { %968 = vmatmul.msk.f32.vlgmr.msra.gmra.mxu3 %vm160_vm1, %v1119_v20 }
 0x44d   :  { %v582_v21 = vpop.f32.mrf.mxu0  ;;  %v602_v45 = vpop.f32.mrf.mxu1 }
 0x44e   :  { %v605_v47 = vadd.f32 %v602_v45, %v582_v21 }
 0x450   :  { %606 = vadd.xlane.f32.xlu0 %v605_v47 }
 0x48b   :  { %v524_v48 = vpop.f32.mrf.mxu2 }
 0x48c   :  { %v553_v20 = vmul.f32 %v524_v48, %v1149_v38  ;;  %v547_v50 = vpop.f32.mrf.mxu3 }
 0x48d   :  { %v554_v51 = vmul.f32 %v547_v50, %v1154_v39 }
 0x48e   :  { %557 = vst [vmem:[%s1450_s7] sm:$0xff] %v553_v20 }
 0x48f   :  { %558 = vst [vmem:[%s1450_s7 + $0x8] sm:$0xff] %v554_v51 }
 0x493   :  { %v527_v52 = vpop.f32.mrf.mxu2 }
 0x494   :  { %v555_v54 = vmul.f32 %v527_v52, %v1134_v26  ;;  %v550_v55 = vpop.f32.mrf.mxu3  ;;  %v51_v26 = vmax.f32 %v1217_v18, %v1222_v19 }
 0x495   :  { %v556_v58 = vmul.f32 %v550_v55, %v1139_v28  ;;  %v60_v28 = vmax.f32 %v1237_v33, %v1242_v34 }
 0x496   :  { %559 = vst [vmem:[%s1450_s7 + $0x10] sm:$0xff] %v555_v54 }
 0x497   :  { %560 = vst [vmem:[%s1450_s7 + $0x18] sm:$0xff] %v556_v58 }
 0x49b   :  { %v765_v59 = vpop.f32.mrf.mxu2 }
 0x49c   :  { %v785_v60 = vpop.f32.mrf.mxu3 }
 0x49d   :  { %v788_v25 = vadd.f32 %v785_v60, %v765_v59 }
 0x49f   :  { %789 = vadd.xlane.f32.xlu1 %v788_v25 }
 0x4c3   :  { %v607_v27 = vpop.xlane.xlu0 %606 }
 0x4c4   :  { %v608_v62 = vmul.f32 0.00390625, %v607_v27 }
 0x4c6   :  { %v609_v63 = vsub.f32 %v582_v21, %v608_v62  ;;  %v610_v2 = vsub.f32 %v602_v45, %v608_v62 }
 0x4c8   :  { %v611_v17 = vmul.f32 %v609_v63, %v609_v63  ;;  %v612_v5 = vmul.f32 %v610_v2, %v610_v2 }
 0x4ca   :  { %v613_v6 = vadd.f32 %v612_v5, %v611_v17 }
 0x4cc   :  { %614 = vadd.xlane.f32.xlu0 %v613_v6 }
 0x4d4   :  { %49 = vmax.xlane.f32.xlu0 %v48_v8 }
 0x4dc   :  { %58 = vmax.xlane.f32.xlu0 %v57_v22 }
 0x512   :  { %v790_v29 = vpop.xlane.xlu1 %789 }
 0x513   :  { %v791_v13 = vmul.f32 0.00390625, %v790_v29 }
 0x515   :  { %v1355_v0 = vsub.f32 %v765_v59, %v791_v13  ;;  %v1357_v1 = vsub.f32 %v785_v60, %v791_v13 }
 0x517   :  { %v794_v38 = vmul.f32 %v1355_v0, %v1355_v0  ;;  %v795_v39 = vmul.f32 %v1357_v1, %v1357_v1 }
 0x519   :  { %v796_v23 = vadd.f32 %v795_v39, %v794_v38 }
 0x51b   :  { %797 = vadd.xlane.f32.xlu1 %v796_v23 }
 0x523   :  { %43 = vmax.xlane.f32.xlu1 %v42_v24 }
 0x52b   :  { %52 = vmax.xlane.f32.xlu1 %v51_v26 }
 0x533   :  { %61 = vmax.xlane.f32.xlu1 %v60_v28 }
 0x53f   :  { %v615_v30 = vpop.xlane.xlu0 %614 }
 0x540   :  { %v616_v31 = vmul.f32 0.003921569, %v615_v30 }
 0x542   :  { %1008 = vrsqrt.f32 %v616_v31  ;;  %vm624_vm6 = vcmp.eq.f32.partialorder %v616_v31, inf  ;;  %v627_v3 = vand.u32 2147483648, %v616_v31  ;;  %vm626_vm0 = vcmp.eq.f32.partialorder %v616_v31, 0.0 }
 0x548   :  { %v1009_v32 = vpop.eup %1008 }
 0x549   :  { %v618_v35 = vmul.f32 %v1009_v32, %v616_v31 }
 0x54b   :  { %v619_v40 = vmul.f32 %v1009_v32, %v618_v35 }
 0x54d   :  { %v620_v41 = vmul.f32 0.5, %v619_v40 }
 0x54f   :  { %v621_v42 = vsub.f32 1.5, %v620_v41 }
 0x551   :  { %v622_v49 = vmul.f32 %v1009_v32, %v621_v42 }
 0x553   :  { %v623_v53 = vmul.f32 %v622_v49, %v616_v31 }
 0x555   :  { %v625_v4 = vsel %vm624_vm6, %v616_v31, %v623_v53 }
 0x556   :  { %v628_v43 = vsel %vm626_vm0, %v627_v3, %v625_v4  ;;  %v47_v3 = vpop.xlane.xlu2 %46  ;;  %vm107_vm0 = vcmask 130112  }
 0x557   :  { %v629_v44 = vadd.f32 1e-05, %v628_v43 }
 0x559   :  { %1010 = vrcp.f32 %v629_v44  ;;  %v641_v48 = vand.u32 2147483648, %v629_v44  ;;  %v639_v50 = vand.u32 2147483647, %v629_v44  ;;  %vm635_vm8 = vweird.f32 %v629_v44 }
 0x55b   :  { %v642_v52 = vor.u32 1.1754944e-38, %v641_v48  ;;  %vm640_vm10 = vcmp.eq.f32.partialorder %v639_v50, 8.507059e+37  ;;  %v105_v50 = vadd.s32 4294967288, %v1102_v9 }
 0x55f   :  { %v1011_v21 = vpop.eup %1010 }
 0x560   :  { %v631_v45 = vmul.f32 %v1011_v21, %v629_v44  ;;  %vm636_vm7 = vweird.f32 %v1011_v21  ;;  %v50_v44 = vpop.xlane.xlu0 %49 }
 0x561   :  { %vm637_vm9 = vmor %vm635_vm8, %vm636_vm7 }
 0x562   :  { %v632_v47 = vsub.f32 1.0, %v631_v45 }
 0x564   :  { %v633_v20 = vmul.f32 %v1011_v21, %v632_v47  ;;  %v56_v47 = vpop.xlane.xlu2 %55 }
 0x566   :  { %v634_v51 = vadd.f32 %v1011_v21, %v633_v20 }
 0x568   :  { %v638_v54 = vsel %vm637_vm9, %v1011_v21, %v634_v51  ;;  %vm123_vm9 = vcmask 261312  }
 0x569   :  { %v643_v55 = vsel %vm640_vm10, %v642_v52, %v638_v54  ;;  %v119_v54 = vadd.s32 4294967280, %v1102_v9  ;;  %vm162_vm10 = vcmask 261120  }
 0x56a   :  { %v645_v58 = vmul.f32 %v643_v55, %v609_v63  ;;  %v646_v59 = vmul.f32 %v643_v55, %v610_v2  ;;  %v121_v55 = vadd.s32 4294967272, %v1102_v9 }
 0x56c   :  { %v647_v60 = vmul.f32 %v645_v58, %v1158_v57  ;;  %v648_v25 = vmul.f32 %v646_v59, %v1158_v57  ;;  %v59_v59 = vpop.xlane.xlu0 %58 }
 0x56e   :  { %v649_v27 = vadd.f32 %v647_v60, %v1162_v10  ;;  %v650_v62 = vadd.f32 %v648_v25, %v1162_v10  ;;  %v106_v60 = vperm.slane %v47_v3, %v105_v50 }
 0x570   :  { %v957_v17 = vmul.f32 -1.442695, %v649_v27  ;;  %v958_v5 = vmul.f32 -1.442695, %v650_v62  ;;  %v109_v27 = vperm.slane %v50_v44, %v1102_v9 }
 0x572   :  { %1012 = vpow2.f32 %v957_v17 }
 0x573   :  { %1014 = vpow2.f32 %v958_v5  ;;  %v65_v5 = vpop.xlane.xlu2 %64 }
 0x578   :  { %v1013_v6 = vpop.eup %1012 }
 0x579   :  { %v1015_v7 = vpop.eup %1014  ;;  %v657_v15 = vadd.f32 1.0, %v1013_v6 }
 0x57a   :  { %v658_v8 = vadd.f32 1.0, %v1015_v7  ;;  %v120_v7 = vperm.slane %v56_v47, %v119_v54 }
 0x57b   :  { %1016 = vrcp.f32 %v657_v15  ;;  %v670_v13 = vand.u32 2147483648, %v657_v15  ;;  %v668_v23 = vand.u32 2147483647, %v657_v15  ;;  %vm664_vm13 = vweird.f32 %v657_v15 }
 0x57c   :  { %1018 = vrcp.f32 %v658_v8  ;;  %v685_v24 = vand.u32 2147483648, %v658_v8  ;;  %v683_v28 = vand.u32 2147483647, %v658_v8  ;;  %vm679_vm2 = vweird.f32 %v658_v8 }
 0x57d   :  { %v671_v31 = vor.u32 1.1754944e-38, %v670_v13  ;;  %vm669_vm3 = vcmp.eq.f32.partialorder %v668_v23, 8.507059e+37 }
 0x57e   :  { %v686_v40 = vor.u32 1.1754944e-38, %v685_v24  ;;  %vm684_vm6 = vcmp.eq.f32.partialorder %v683_v28, 8.507059e+37 }
 0x581   :  { %v1017_v63 = vpop.eup %1016 }
 0x582   :  { %v1019_v2 = vpop.eup %1018  ;;  %v660_v16 = vmul.f32 %v1017_v63, %v657_v15  ;;  %vm665_vm11 = vweird.f32 %v1017_v63  ;;  %v122_v15 = vperm.slane %v59_v59, %v121_v55 }
 0x583   :  { %v675_v22 = vmul.f32 %v1019_v2, %v658_v8  ;;  %vm680_vm12 = vweird.f32 %v1019_v2  ;;  %vm666_vm15 = vmor %vm664_vm13, %vm665_vm11  ;;  %vm164_vm11 = vcmask 392192  }
 0x584   :  { %v661_v29 = vsub.f32 1.0, %v660_v16  ;;  %vm681_vm5 = vmor %vm679_vm2, %vm680_vm12  ;;  %vm169_vm12 = vcmask 516096  }
 0x585   :  { %v676_v38 = vsub.f32 1.0, %v675_v22  ;;  %v126_v22 = vperm.slane %v65_v5, %v121_v55 }
 0x586   :  { %v662_v39 = vmul.f32 %v1017_v63, %v661_v29 }
 0x587   :  { %v677_v26 = vmul.f32 %v1019_v2, %v676_v38  ;;  %v124_v38 = vsel %vm123_vm9, %v122_v15, %v120_v7 }
 0x588   :  { %v663_v30 = vadd.f32 %v1017_v63, %v662_v39 }
 0x589   :  { %v678_v32 = vadd.f32 %v1019_v2, %v677_v26 }
 0x58a   :  { %v667_v35 = vsel %vm666_vm15, %v1017_v63, %v663_v30 }
 0x58b   :  { %v672_v41 = vsel %vm669_vm3, %v671_v31, %v667_v35  ;;  %v682_v42 = vsel %vm681_vm5, %v1019_v2, %v678_v32 }
 0x58c   :  { %704 = vmatpush.msra.mxu0 %v672_v41  ;;  %v687_v49 = vsel %vm684_vm6, %v686_v40, %v682_v42 }
 0x58d   :  { %727 = vmatpush.msra.mxu1 %v687_v49  ;;  %959 = vmatmul.msk.f32.vlgmr.msra.gmra.mxu0 %vm318_vm14, %v1181_v56 }
 0x58e   :  { %v798_v53 = vpop.xlane.xlu1 %797  ;;  %961 = vmatmul.msk.f32.vlgmr.msra.gmra.mxu1 %vm318_vm14, %v1181_v56 }
 0x58f   :  { %v799_v4 = vmul.f32 0.003921569, %v798_v53 }
 0x591   :  { %1020 = vrsqrt.f32 %v799_v4  ;;  %vm807_vm7 = vcmp.eq.f32.partialorder %v799_v4, inf  ;;  %v810_v6 = vand.u32 2147483648, %v799_v4  ;;  %vm809_vm8 = vcmp.eq.f32.partialorder %v799_v4, 0.0 }
 0x595   :  { %960 = vmatmul.msk.f32.gmra.mxu0 %vm318_vm14, %v1263_v46 }
 0x596   :  { %v44_v43 = vpop.xlane.xlu1 %43  ;;  %962 = vmatmul.msk.f32.gmra.mxu1 %vm318_vm14, %v1263_v46 }
 0x597   :  { %v1021_v21 = vpop.eup %1020  ;;  %v104_v25 = vperm.slane %v44_v43, %v1102_v9 }
 0x598   :  { %v801_v45 = vmul.f32 %v1021_v21, %v799_v4 }
 0x599   :  { %v108_v2 = vsel %vm107_vm0, %v106_v60, %v104_v25 }
 0x59a   :  { %v802_v48 = vmul.f32 %v1021_v21, %v801_v45 }
 0x59c   :  { %v803_v20 = vmul.f32 0.5, %v802_v48 }
 0x59e   :  { %v804_v51 = vsub.f32 1.5, %v803_v20  ;;  %v53_v52 = vpop.xlane.xlu1 %52 }
 0x59f   :  { %v110_v62 = vperm.slane %v53_v52, %v105_v50 }
 0x5a0   :  { %v805_v58 = vmul.f32 %v1021_v21, %v804_v51 }
 0x5a1   :  { %v111_v16 = vsel %vm107_vm0, %v110_v62, %v109_v27 }
 0x5a2   :  { %v806_v17 = vmul.f32 %v805_v58, %v799_v4  ;;  %v113_v9 = vsel %vm112_vm4, %v111_v16, %v108_v2 }
 0x5a4   :  { %v808_v8 = vsel %vm807_vm7, %v799_v4, %v806_v17 }
 0x5a5   :  { %v811_v63 = vsel %vm809_vm8, %v810_v6, %v808_v8 }
 0x5a6   :  { %v812_v29 = vadd.f32 1e-05, %v811_v63  ;;  %v62_v13 = vpop.xlane.xlu1 %61 }
 0x5a7   :  { %v125_v39 = vperm.slane %v62_v13, %v119_v54 }
 0x5a8   :  { %1022 = vrcp.f32 %v812_v29  ;;  %v824_v41 = vand.u32 2147483648, %v812_v29  ;;  %v822_v49 = vand.u32 2147483647, %v812_v29 }
 0x5a9   :  { %v127_v23 = vsel %vm123_vm9, %v126_v22, %v125_v39 }
 0x5aa   :  { %v128_v24 = vsel %vm112_vm4, %v127_v23, %v124_v38  ;;  %vm823_vm15 = vcmp.eq.f32.partialorder %v822_v49, 8.507059e+37 }
 0x5ab   :  { %v161_v26 = vsel %vm160_vm1, %v113_v9, %v128_v24  ;;  %vm818_vm1 = vweird.f32 %v812_v29 }
 0x5ac   :  { %v163_v28 = vsel %vm162_vm10, %v161_v26, %v1293_v12 }
 0x5ad   :  { %v165_v30 = vsel %vm164_vm11, %v163_v28, %v1280_v61  ;;  %v825_v61 = vor.u32 1.1754944e-38, %v824_v41 }
 0x5ae   :  { %v1023_v31 = vpop.eup %1022  ;;  %v167_v32 = vrot.slane %v165_v30, 1  ;;  %170 = vst.msk [vmem:[%s1451_s8] sm:$0x1] %vm169_vm12, %v165_v30 }
 0x5af   :  { %v814_v35 = vmul.f32 %v1023_v31, %v812_v29  ;;  %vm819_vm4 = vweird.f32 %v1023_v31 }
 0x5b0   :  { %171 = vst.msk [vmem:[%s1451_s8 + $0x1] sm:$0x1] %vm169_vm12, %v167_v32  ;;  %vm820_vm13 = vmor %vm818_vm1, %vm819_vm4 }
 0x5b1   :  { %v815_v40 = vsub.f32 1.0, %v814_v35 }
 0x5b3   :  { %v816_v42 = vmul.f32 %v1023_v31, %v815_v40 }
 0x5b5   :  { %v817_v53 = vadd.f32 %v1023_v31, %v816_v42 }
 0x5b7   :  { %v821_v12 = vsel %vm820_vm13, %v1023_v31, %v817_v53 }
 0x5b8   :  { %v826_v3 = vsel %vm823_vm15, %v825_v61, %v821_v12 }
 0x5b9   :  { %v828_v4 = vmul.f32 %v826_v3, %v1355_v0  ;;  %v829_v43 = vmul.f32 %v826_v3, %v1357_v1 }
 0x5bb   :  { %v830_v44 = vmul.f32 %v828_v4, %v1158_v57  ;;  %v831_v21 = vmul.f32 %v829_v43, %v1158_v57 }
 0x5bd   :  { %v832_v45 = vadd.f32 %v830_v44, %v1162_v10  ;;  %v833_v47 = vadd.f32 %v831_v21, %v1162_v10 }
 0x5bf   :  { %v969_v48 = vmul.f32 -1.442695, %v832_v45  ;;  %v970_v20 = vmul.f32 -1.442695, %v833_v47 }
 0x5c1   :  { %1024 = vpow2.f32 %v969_v48 }
 0x5c2   :  { %1026 = vpow2.f32 %v970_v20 }
 0x5c7   :  { %v1025_v50 = vpop.eup %1024 }
 0x5c8   :  { %v1027_v51 = vpop.eup %1026  ;;  %v840_v52 = vadd.f32 1.0, %v1025_v50 }
 0x5c9   :  { %v841_v54 = vadd.f32 1.0, %v1027_v51 }
 0x5ca   :  { %1028 = vrcp.f32 %v840_v52  ;;  %v853_v57 = vand.u32 2147483648, %v840_v52  ;;  %v851_v10 = vand.u32 2147483647, %v840_v52  ;;  %vm847_vm5 = vweird.f32 %v840_v52 }
 0x5cb   :  { %1030 = vrcp.f32 %v841_v54  ;;  %v868_v27 = vand.u32 2147483648, %v841_v54  ;;  %v866_v17 = vand.u32 2147483647, %v841_v54  ;;  %vm862_vm0 = vweird.f32 %v841_v54 }
 0x5cc   :  { %v854_v6 = vor.u32 1.1754944e-38, %v853_v57  ;;  %vm852_vm7 = vcmp.eq.f32.partialorder %v851_v10, 8.507059e+37 }
 0x5cd   :  { %v869_v8 = vor.u32 1.1754944e-38, %v868_v27  ;;  %vm867_vm9 = vcmp.eq.f32.partialorder %v866_v17, 8.507059e+37 }
 0x5d0   :  { %v1029_v0 = vpop.eup %1028 }
 0x5d1   :  { %v1031_v1 = vpop.eup %1030  ;;  %v843_v55 = vmul.f32 %v1029_v0, %v840_v52  ;;  %vm848_vm2 = vweird.f32 %v1029_v0 }
 0x5d2   :  { %v858_v58 = vmul.f32 %v1031_v1, %v841_v54  ;;  %vm863_vm3 = vweird.f32 %v1031_v1  ;;  %vm849_vm6 = vmor %vm847_vm5, %vm848_vm2 }
 0x5d3   :  { %v844_v59 = vsub.f32 1.0, %v843_v55  ;;  %vm864_vm8 = vmor %vm862_vm0, %vm863_vm3 }
 0x5d4   :  { %v859_v60 = vsub.f32 1.0, %v858_v58 }
 0x5d5   :  { %v845_v25 = vmul.f32 %v1029_v0, %v844_v59 }
 0x5d6   :  { %v860_v62 = vmul.f32 %v1031_v1, %v859_v60 }
 0x5d7   :  { %v846_v5 = vadd.f32 %v1029_v0, %v845_v25 }
 0x5d8   :  { %v861_v7 = vadd.f32 %v1031_v1, %v860_v62 }
 0x5d9   :  { %v850_v15 = vsel %vm849_vm6, %v1029_v0, %v846_v5 }
 0x5da   :  { %v855_v63 = vsel %vm852_vm7, %v854_v6, %v850_v15  ;;  %v865_v2 = vsel %vm864_vm8, %v1031_v1, %v861_v7 }
 0x5db   :  { %887 = vmatpush.msrb.mxu2 %v855_v63  ;;  %v870_v16 = vsel %vm867_vm9, %v869_v8, %v865_v2 }
 0x5dc   :  { %910 = vmatpush.msrb.mxu3 %v870_v16  ;;  %971 = vmatmul.msk.f32.vlgmr.msrb.gmra.mxu2 %vm318_vm14, %v1181_v56 }
 0x5dd   :  { %973 = vmatmul.msk.f32.vlgmr.msrb.gmra.mxu3 %vm318_vm14, %v1181_v56 }
 0x5e4   :  { %972 = vmatmul.msk.f32.gmra.mxu2 %vm318_vm14, %v1263_v46 }
 0x5e5   :  { %974 = vmatmul.msk.f32.gmra.mxu3 %vm318_vm14, %v1263_v46 }
 0x60a   :  { %v706_v22 = vpop.f32.mrf.mxu0 }
 0x60b   :  { %v735_v29 = vmul.f32 %v706_v22, %v1249_v36  ;;  %v729_v13 = vpop.f32.mrf.mxu1 }
 0x60c   :  { %v736_v38 = vmul.f32 %v729_v13, %v1254_v37 }
 0x60d   :  { %963 = vst [vmem:[%s1449_s6 + $0x20] sm:$0xff] %v735_v29 }
 0x60e   :  { %964 = vst [vmem:[%s1449_s6 + $0x28] sm:$0xff] %v736_v38 }
 0x612   :  { %v709_v56 = vpop.f32.mrf.mxu0 }
 0x613   :  { %v732_v39 = vpop.f32.mrf.mxu1  ;;  %v737_v9 = vmul.f32 %v709_v56, %v1217_v18 }
 0x614   :  { %v738_v46 = vmul.f32 %v732_v39, %v1222_v19 }
 0x615   :  { %965 = vst [vmem:[%s1449_s6 + $0x30] sm:$0xff] %v737_v9 }
 0x616   :  { %966 = vst [vmem:[%s1449_s6 + $0x38] sm:$0xff] %v738_v46 }
 0x65f   :  { %v889_v36 = vpop.f32.mrf.mxu2 }
 0x660   :  { %v918_v37 = vmul.f32 %v889_v36, %v1237_v33  ;;  %v912_v23 = vpop.f32.mrf.mxu3 }
 0x661   :  { %v919_v24 = vmul.f32 %v912_v23, %v1242_v34 }
 0x662   :  { %975 = vst [vmem:[%s1450_s7 + $0x20] sm:$0xff] %v918_v37 }
 0x663   :  { %976 = vst [vmem:[%s1450_s7 + $0x28] sm:$0xff] %v919_v24 }
 0x667   :  { %v892_v18 = vpop.f32.mrf.mxu2 }
 0x668   :  { %v920_v19 = vmul.f32 %v892_v18, %v1205_v11  ;;  %v915_v26 = vpop.f32.mrf.mxu3 }
 0x669   :  { %v921_v28 = vmul.f32 %v915_v26, %v1210_v14 }
 0x66a   :  { %977 = vst [vmem:[%s1450_s7 + $0x30] sm:$0xff] %v920_v19 }
 0x66b   :  { %978 = vst [vmem:[%s1450_s7 + $0x38] sm:$0xff] %v921_v28 }

</bundles_post_ra>
